<compile_context>
chip_gen: v7x
topology: tpu7x:2x2x1
jax: 0.10.0
libtpu: 0.0.40
codegen_flags: <defaults>
</compile_context>

<pallas_src>
import functools
import math

import jax
import jax.numpy as jnp
from jax import lax
from jax.experimental import pallas as pl
from jax.experimental.pallas import tpu as pltpu


# ----------------------------------------------------------------------------
# Fused Pallas kernel: all LSTM layers + MLP head, everything resident in VMEM
# ----------------------------------------------------------------------------
def fused_lstm_mlp_kernel(x_ref, wih0_ref, wihr_ref, whh_ref, bg_ref,
                          w1_ref, b1_ref, w2_ref, b2_ref,
                          out_ref,
                          seq_ref, xg_ref):
    """Fused multi-layer LSTM + (fc1 -> ReLU -> fc2) head.

    x_ref    : (T*BP, IP)     time-major, row-blocked input (BP rows per step)
    wih0_ref : (IP, G)        layer-0 input->gates weights (G = 4*H, padded to 128)
    wihr_ref : (max(L-1,1), H, G)  layer>=1 input->gates weights
    whh_ref  : (L, H, G)      hidden->gates weights
    bg_ref   : (L, 1, G)      combined gate bias b_ih + b_hh
    w1_ref   : (H, MP)        fc1 weight (zero padded), b1_ref: (1, MP)
    w2_ref   : (MP, CP)       fc2 weight (zero padded), b2_ref: (1, CP)
    out_ref  : (BP, CP)       padded logits
    seq_ref  : (T*BP, H)      VMEM scratch - per-layer output sequence
    xg_ref   : (T*BP, G)      VMEM scratch - hoisted input projection

    PyTorch gate order along the G axis: i, f, g, o (each block H wide).
    """
    BP, _ = out_ref.shape
    TBP, H = seq_ref.shape
    T = TBP // BP
    G = xg_ref.shape[1]
    L = whh_ref.shape[0]

    # Loop-invariant lane mask selecting the 'g' (candidate) gate block, where
    # tanh is used instead of sigmoid.  Hoisted (JAX does not CSE broadcasts).
    lane = lax.broadcasted_iota(jnp.int32, (BP, G), 1)
    g_mask = (lane >= 2 * H) & (lane < 3 * H)

    h_last = None
    for layer in range(L):
        # Hoisted input projection + bias: one large MXU matmul for the whole
        # sequence, off the serial recurrence critical path.
        if layer == 0:
            xg_ref[...] = (
                jnp.dot(x_ref[...], wih0_ref[...],
                        preferred_element_type=jnp.float32) + bg_ref[0]
            )
        else:
            xg_ref[...] = (
                jnp.dot(seq_ref[...], wihr_ref[layer - 1],
                        preferred_element_type=jnp.float32) + bg_ref[layer]
            )

        whh_l = whh_ref[layer]            # (H, G) f32 = 4 vregs, loop-invariant
        write_seq = layer != L - 1        # last layer: only h_last is needed

        h0 = jnp.zeros((BP, H), jnp.float32)
        c0 = jnp.zeros((BP, H), jnp.float32)

        def step(t, carry, whh_l=whh_l, write_seq=write_seq):
            h, c = carry                               # vreg-resident state
            row = pl.multiple_of(t * BP, BP)           # sublane-aligned offset
            gates = xg_ref[pl.ds(row, BP), :] + jnp.dot(
                h, whh_l, preferred_element_type=jnp.float32)     # (BP, G)

            # 2 full-vreg transcendentals + 1 VPU select (instead of 4 EUP ops)
            sg = jax.nn.sigmoid(gates)
            th = jnp.tanh(gates)
            act = jnp.where(g_mask, th, sg)

            i_g = act[:, 0 * H:1 * H]
            f_g = act[:, 1 * H:2 * H]
            g_g = act[:, 2 * H:3 * H]
            o_g = act[:, 3 * H:4 * H]

            c_new = f_g * c + i_g * g_g
            h_new = o_g * jnp.tanh(c_new)
            if write_seq:
                seq_ref[pl.ds(row, BP), :] = h_new
            return (h_new, c_new)

        # Fully unrolled: gives the LLO scheduler cross-step visibility
        # (MXU/EUP/VPU interleave); T is small and static.
        h_last, _ = lax.fori_loop(0, T, step, (h0, c0), unroll=True)

    # MLP head on the last layer's final hidden state (== out[:, -1, :]).
    z = jnp.dot(h_last, w1_ref[...],
                preferred_element_type=jnp.float32) + b1_ref[...]
    z = jnp.maximum(z, 0.0)
    out_ref[...] = (
        jnp.dot(z, w2_ref[...], preferred_element_type=jnp.float32) + b2_ref[...]
    )


# ----------------------------------------------------------------------------
# Wrapper
# ----------------------------------------------------------------------------
@functools.partial(jax.jit, static_argnames=("num_classes",))
def lstm_model_forward(x, packed, num_classes):
    """x: (B, T, input_size), batch-first like PyTorch nn.LSTM(batch_first=True)."""
    B, T, I = x.shape
    L, H, G = packed["whh"].shape
    IP = packed["wih0"].shape[0]
    MP = packed["w1"].shape[1]
    CP = packed["w2"].shape[1]
    BP = ((B + 7) // 8) * 8              # pad batch to a sublane multiple
    assert I <= IP, "input_size must fit in the padded input width"

    x_tm = jnp.transpose(x, (1, 0, 2))                        # (T, B, I)
    x_p = jnp.pad(x_tm, ((0, 0), (0, BP - B), (0, IP - I)))   # (T, BP, IP)
    x_2d = x_p.reshape(T * BP, IP)                            # row-blocked

    # Advisory cost estimate so XLA can overlap surrounding HLOs.
    flops = (2 * T * BP * IP * G                 # layer-0 input projection
             + 2 * (L - 1) * T * BP * H * G      # later-layer input projections
             + 2 * L * T * BP * H * G            # recurrent matmuls
             + 2 * BP * H * MP + 2 * BP * MP * CP)
    transcendentals = L * T * BP * (2 * G + H)
    bytes_accessed = 4 * (x_2d.size + packed["wih0"].size + packed["wihr"].size
                          + packed["whh"].size + packed["bg"].size
                          + packed["w1"].size + packed["b1"].size
                          + packed["w2"].size + packed["b2"].size + BP * CP)

    out_pad = pl.pallas_call(
        fused_lstm_mlp_kernel,
        out_shape=jax.ShapeDtypeStruct((BP, CP), jnp.float32),
        in_specs=[pl.BlockSpec(memory_space=pltpu.MemorySpace.VMEM)] * 9,
        out_specs=pl.BlockSpec(memory_space=pltpu.MemorySpace.VMEM),
        scratch_shapes=[
            pltpu.VMEM((T * BP, H), jnp.float32),   # layer output sequence
            pltpu.VMEM((T * BP, G), jnp.float32),   # hoisted input projection
        ],
        cost_estimate=pl.CostEstimate(flops=flops,
                                      transcendentals=transcendentals,
                                      bytes_accessed=bytes_accessed),
    )(x_2d, packed["wih0"], packed["wihr"], packed["whh"], packed["bg"],
      packed["w1"], packed["b1"], packed["w2"], packed["b2"])

    return out_pad[:B, :num_classes]


# ----------------------------------------------------------------------------
# Parameter init (PyTorch layout) and packed layout for the kernel
# ----------------------------------------------------------------------------
def init_params(key, input_size, hidden_size, num_layers, num_classes):
    """PyTorch-style parameters: uniform(-1/sqrt(fan_in), 1/sqrt(fan_in))."""
    H = hidden_size
    k = 1.0 / math.sqrt(H)
    params = {"lstm_layers": []}
    for layer in range(num_layers):
        in_sz = input_size if layer == 0 else H
        key, k1, k2, k3, k4 = jax.random.split(key, 5)
        params["lstm_layers"].append({
            "w_ih": jax.random.uniform(k1, (4 * H, in_sz), jnp.float32, -k, k),
            "w_hh": jax.random.uniform(k2, (4 * H, H), jnp.float32, -k, k),
            "b_ih": jax.random.uniform(k3, (4 * H,), jnp.float32, -k, k),
            "b_hh": jax.random.uniform(k4, (4 * H,), jnp.float32, -k, k),
        })
    kf1 = 1.0 / math.sqrt(H)
    key, k1, k2 = jax.random.split(key, 3)
    params["w1"] = jax.random.uniform(k1, (25, H), jnp.float32, -kf1, kf1)
    params["b1"] = jax.random.uniform(k2, (25,), jnp.float32, -kf1, kf1)
    kf2 = 1.0 / math.sqrt(25)
    key, k1, k2 = jax.random.split(key, 3)
    params["w2"] = jax.random.uniform(k1, (num_classes, 25), jnp.float32, -kf2, kf2)
    params["b2"] = jax.random.uniform(k2, (num_classes,), jnp.float32, -kf2, kf2)
    return params


def _pad_to(a, shape):
    return jnp.pad(a, [(0, s - d) for d, s in zip(a.shape, shape)])


def pack_params(params, input_size, hidden_size):
    """Transpose + zero-pad weights into the compact-gate layout the kernel uses.

    Gate axis G = 4*H rounded up to 128 lanes (exactly 128 for H=32); hidden
    contraction dims stay at the true H so the per-step recurrent matmul RHS
    is only (H, G).
    """
    H = hidden_size
    G = max(128, ((4 * H + 127) // 128) * 128)
    IP = max(128, ((input_size + 127) // 128) * 128)
    MP = 128   # padded fc1 width (25 -> 128)
    CP = 128   # padded class width
    layers = params["lstm_layers"]
    L = len(layers)

    wih0 = _pad_to(layers[0]["w_ih"].T, (IP, G))               # (IP, G)
    if L > 1:
        wihr = jnp.stack([_pad_to(l["w_ih"].T, (H, G)) for l in layers[1:]])
    else:
        wihr = jnp.zeros((1, H, G), jnp.float32)               # dummy, unused
    whh = jnp.stack([_pad_to(l["w_hh"].T, (H, G)) for l in layers])
    bg = jnp.stack([_pad_to((l["b_ih"] + l["b_hh"]).reshape(1, -1), (1, G))
                    for l in layers])

    return {
        "wih0": wih0,                                          # (IP, G)
        "wihr": wihr,                                          # (max(L-1,1), H, G)
        "whh": whh,                                            # (L, H, G)
        "bg": bg,                                              # (L, 1, G)
        "w1": _pad_to(params["w1"].T, (H, MP)),                # (H, 128)
        "b1": _pad_to(params["b1"].reshape(1, -1), (1, MP)),   # (1, 128)
        "w2": _pad_to(params["w2"].T, (MP, CP)),               # (128, 128)
        "b2": _pad_to(params["b2"].reshape(1, -1), (1, CP)),   # (1, 128)
    }


# ----------------------------------------------------------------------------
# Pure-JAX reference (same math, unpadded) for a sanity check
# ----------------------------------------------------------------------------
def reference_forward(x, params):
    B = x.shape[0]
    seq = jnp.transpose(x, (1, 0, 2))  # (T, B, I)
    H = params["lstm_layers"][0]["w_hh"].shape[1]
    for layer in params["lstm_layers"]:
        wih_t = layer["w_ih"].T
        whh_t = layer["w_hh"].T
        b = (layer["b_ih"] + layer["b_hh"]).reshape(1, -1)
        h = jnp.zeros((B, H), jnp.float32)
        c = jnp.zeros((B, H), jnp.float32)

        def step(carry, x_t, wih_t=wih_t, whh_t=whh_t, b=b):
            h, c = carry
            gates = x_t @ wih_t + h @ whh_t + b
            i_g = jax.nn.sigmoid(gates[:, 0 * H:1 * H])
            f_g = jax.nn.sigmoid(gates[:, 1 * H:2 * H])
            g_g = jnp.tanh(gates[:, 2 * H:3 * H])
            o_g = jax.nn.sigmoid(gates[:, 3 * H:4 * H])
            c = f_g * c + i_g * g_g
            h = o_g * jnp.tanh(c)
            return (h, c), h

        (_, _), seq = lax.scan(step, (h, c), seq)
    h_last = seq[-1]
    z = jnp.maximum(h_last @ params["w1"].T + params["b1"], 0.0)
    return z @ params["w2"].T + params["b2"]


# ----------------------------------------------------------------------------
if __name__ == "__main__":
    batch, seq_len = 2, 8
    input_size, hidden_size, num_layers, num_classes = 16, 32, 2, 5

    key = jax.random.PRNGKey(0)
    key, xkey = jax.random.split(key)
    x = jax.random.normal(xkey, (batch, seq_len, input_size), jnp.float32)

    params = init_params(key, input_size, hidden_size, num_layers, num_classes)
    packed = pack_params(params, input_size, hidden_size)

    out = jax.block_until_ready(lstm_model_forward(x, packed, num_classes))
    ref = jax.block_until_ready(reference_forward(x, params))

    assert out.shape == (batch, num_classes)
    assert jnp.allclose(out, ref, atol=1e-4, rtol=1e-4), "mismatch vs reference"
    print("KERNEL_OK")
</pallas_src>

<mosaic_0001>
module attributes {stable_mosaic.version = 11 : i64} {
  func.func @fused_lstm_mlp_kernel(%arg0: memref<64x128xf32, #tpu.memory_space<vmem>>, %arg1: memref<128x128xf32, #tpu.memory_space<vmem>>, %arg2: memref<1x32x128xf32, #tpu.memory_space<vmem>>, %arg3: memref<2x32x128xf32, #tpu.memory_space<vmem>>, %arg4: memref<2x1x128xf32, #tpu.memory_space<vmem>>, %arg5: memref<32x128xf32, #tpu.memory_space<vmem>>, %arg6: memref<1x128xf32, #tpu.memory_space<vmem>>, %arg7: memref<128x128xf32, #tpu.memory_space<vmem>>, %arg8: memref<1x128xf32, #tpu.memory_space<vmem>>, %arg9: memref<8x128xf32, #tpu.memory_space<vmem>>, %arg10: memref<64x32xf32, #tpu.memory_space<vmem>>, %arg11: memref<64x128xf32, #tpu.memory_space<vmem>>) attributes {dimension_semantics = [], scalar_prefetch = 0 : i64, scratch_operands = 2 : i64, tpu.core_type = #tpu.core_type<tc>} {
    %0 = tpu.iota {dimensions = array<i32: 1>} : vector<8x128xi32>
    %c64_i32 = arith.constant 64 : i32
    %1 = vector.broadcast %c64_i32 : i32 to vector<8x128xi32>
    %2 = arith.cmpi sge, %0, %1 : vector<8x128xi32>
    %c96_i32 = arith.constant 96 : i32
    %3 = vector.broadcast %c96_i32 : i32 to vector<8x128xi32>
    %4 = arith.cmpi slt, %0, %3 : vector<8x128xi32>
    %5 = arith.andi %2, %4 : vector<8x128xi1>
    %c0 = arith.constant 0 : index
    %c0_0 = arith.constant 0 : index
    %6 = vector.load %arg0[%c0, %c0_0] : memref<64x128xf32, #tpu.memory_space<vmem>>, vector<64x128xf32>
    %c0_1 = arith.constant 0 : index
    %c0_2 = arith.constant 0 : index
    %7 = vector.load %arg1[%c0_1, %c0_2] : memref<128x128xf32, #tpu.memory_space<vmem>>, vector<128x128xf32>
    %cst = arith.constant dense<0.000000e+00> : vector<64x128xf32>
    %8 = tpu.matmul %6, %7, %cst {dimension_numbers = #tpu.dot_dimension_numbers<[1], [0], [0], [1], [0, 0, 1, 1], [], []>} : vector<64x128xf32>, vector<128x128xf32>, vector<64x128xf32> -> vector<64x128xf32>
    %c0_3 = arith.constant 0 : index
    %c0_4 = arith.constant 0 : index
    %c0_5 = arith.constant 0 : index
    %9 = vector.load %arg4[%c0_3, %c0_4, %c0_5] : memref<2x1x128xf32, #tpu.memory_space<vmem>>, vector<1x1x128xf32>
    %10 = vector.shape_cast %9 : vector<1x1x128xf32> to vector<1x128xf32>
    %11 = vector.broadcast %10 : vector<1x128xf32> to vector<64x128xf32>
    %12 = arith.addf %8, %11 : vector<64x128xf32>
    %c0_6 = arith.constant 0 : index
    %c0_7 = arith.constant 0 : index
    %13 = vector.load %arg11[%c0_6, %c0_7] : memref<64x128xf32, #tpu.memory_space<vmem>>, vector<64x128xf32>
    tpu.vector_store %arg11[%c0_6, %c0_7], %12 {strides = array<i32>} : memref<64x128xf32, #tpu.memory_space<vmem>>, vector<64x128xf32>,
    %c0_8 = arith.constant 0 : index
    %c0_9 = arith.constant 0 : index
    %c0_10 = arith.constant 0 : index
    %14 = vector.load %arg3[%c0_8, %c0_9, %c0_10] : memref<2x32x128xf32, #tpu.memory_space<vmem>>, vector<1x32x128xf32>
    %15 = vector.shape_cast %14 : vector<1x32x128xf32> to vector<32x128xf32>
    %cst_11 = arith.constant 0.000000e+00 : f32
    %16 = vector.broadcast %cst_11 : f32 to vector<8x32xf32>
    %cst_12 = arith.constant 0.000000e+00 : f32
    %17 = vector.broadcast %cst_12 : f32 to vector<8x32xf32>
    %c0_i32 = arith.constant 0 : i32
    %c8_i32 = arith.constant 8 : i32
    %18 = arith.muli %c0_i32, %c8_i32 : i32
    %19 = tpu.assume_multiple %18, 8 : i32
    %20 = arith.index_cast %19 : i32 to index
    %c0_13 = arith.constant 0 : index
    %21 = vector.load %arg11[%20, %c0_13] : memref<64x128xf32, #tpu.memory_space<vmem>>, vector<8x128xf32>
    %cst_14 = arith.constant dense<0.000000e+00> : vector<8x128xf32>
    %22 = tpu.matmul %16, %15, %cst_14 {dimension_numbers = #tpu.dot_dimension_numbers<[1], [0], [0], [1], [0, 0, 1, 1], [], []>} : vector<8x32xf32>, vector<32x128xf32>, vector<8x128xf32> -> vector<8x128xf32>
    %23 = arith.addf %21, %22 : vector<8x128xf32>
    %24 = arith.negf %23 : vector<8x128xf32>
    %25 = math.exp %24 : vector<8x128xf32>
    %cst_15 = arith.constant 1.000000e+00 : f32
    %26 = vector.broadcast %cst_15 : f32 to vector<8x128xf32>
    %27 = arith.addf %26, %25 : vector<8x128xf32>
    %28 = arith.divf %26, %27 : vector<8x128xf32>
    %29 = math.tanh %23 : vector<8x128xf32>
    %30 = arith.select %5, %29, %28 : vector<8x128xi1>, vector<8x128xf32>
    %31 = vector.extract_strided_slice %30 {offsets = [0, 0], sizes = [8, 32], strides = [1, 1]} : vector<8x128xf32> to vector<8x32xf32>
    %32 = vector.extract_strided_slice %30 {offsets = [0, 32], sizes = [8, 32], strides = [1, 1]} : vector<8x128xf32> to vector<8x32xf32>
    %33 = vector.extract_strided_slice %30 {offsets = [0, 64], sizes = [8, 32], strides = [1, 1]} : vector<8x128xf32> to vector<8x32xf32>
    %34 = vector.extract_strided_slice %30 {offsets = [0, 96], sizes = [8, 32], strides = [1, 1]} : vector<8x128xf32> to vector<8x32xf32>
    %35 = arith.mulf %32, %17 : vector<8x32xf32>
    %36 = arith.mulf %31, %33 : vector<8x32xf32>
    %37 = arith.addf %35, %36 : vector<8x32xf32>
    %38 = math.tanh %37 : vector<8x32xf32>
    %39 = arith.mulf %34, %38 : vector<8x32xf32>
    %40 = arith.index_cast %19 : i32 to index
    %c0_16 = arith.constant 0 : index
    %41 = vector.load %arg10[%40, %c0_16] : memref<64x32xf32, #tpu.memory_space<vmem>>, vector<8x32xf32>
    tpu.vector_store %arg10[%40, %c0_16], %39 {strides = array<i32>} : memref<64x32xf32, #tpu.memory_space<vmem>>, vector<8x32xf32>,
    %c1_i32 = arith.constant 1 : i32
    %c8_i32_17 = arith.constant 8 : i32
    %42 = arith.muli %c1_i32, %c8_i32_17 : i32
    %43 = tpu.assume_multiple %42, 8 : i32
    %44 = arith.index_cast %43 : i32 to index
    %c0_18 = arith.constant 0 : index
    %45 = vector.load %arg11[%44, %c0_18] : memref<64x128xf32, #tpu.memory_space<vmem>>, vector<8x128xf32>
    %cst_19 = arith.constant dense<0.000000e+00> : vector<8x128xf32>
    %46 = tpu.matmul %39, %15, %cst_19 {dimension_numbers = #tpu.dot_dimension_numbers<[1], [0], [0], [1], [0, 0, 1, 1], [], []>} : vector<8x32xf32>, vector<32x128xf32>, vector<8x128xf32> -> vector<8x128xf32>
    %47 = arith.addf %45, %46 : vector<8x128xf32>
    %48 = arith.negf %47 : vector<8x128xf32>
    %49 = math.exp %48 : vector<8x128xf32>
    %cst_20 = arith.constant 1.000000e+00 : f32
    %50 = vector.broadcast %cst_20 : f32 to vector<8x128xf32>
    %51 = arith.addf %50, %49 : vector<8x128xf32>
    %52 = arith.divf %50, %51 : vector<8x128xf32>
    %53 = math.tanh %47 : vector<8x128xf32>
    %54 = arith.select %5, %53, %52 : vector<8x128xi1>, vector<8x128xf32>
    %55 = vector.extract_strided_slice %54 {offsets = [0, 0], sizes = [8, 32], strides = [1, 1]} : vector<8x128xf32> to vector<8x32xf32>
    %56 = vector.extract_strided_slice %54 {offsets = [0, 32], sizes = [8, 32], strides = [1, 1]} : vector<8x128xf32> to vector<8x32xf32>
    %57 = vector.extract_strided_slice %54 {offsets = [0, 64], sizes = [8, 32], strides = [1, 1]} : vector<8x128xf32> to vector<8x32xf32>
    %58 = vector.extract_strided_slice %54 {offsets = [0, 96], sizes = [8, 32], strides = [1, 1]} : vector<8x128xf32> to vector<8x32xf32>
    %59 = arith.mulf %56, %37 : vector<8x32xf32>
    %60 = arith.mulf %55, %57 : vector<8x32xf32>
    %61 = arith.addf %59, %60 : vector<8x32xf32>
    %62 = math.tanh %61 : vector<8x32xf32>
    %63 = arith.mulf %58, %62 : vector<8x32xf32>
    %64 = arith.index_cast %43 : i32 to index
    %c0_21 = arith.constant 0 : index
    %65 = vector.load %arg10[%64, %c0_21] : memref<64x32xf32, #tpu.memory_space<vmem>>, vector<8x32xf32>
    tpu.vector_store %arg10[%64, %c0_21], %63 {strides = array<i32>} : memref<64x32xf32, #tpu.memory_space<vmem>>, vector<8x32xf32>,
    %c2_i32 = arith.constant 2 : i32
    %c8_i32_22 = arith.constant 8 : i32
    %66 = arith.muli %c2_i32, %c8_i32_22 : i32
    %67 = tpu.assume_multiple %66, 8 : i32
    %68 = arith.index_cast %67 : i32 to index
    %c0_23 = arith.constant 0 : index
    %69 = vector.load %arg11[%68, %c0_23] : memref<64x128xf32, #tpu.memory_space<vmem>>, vector<8x128xf32>
    %cst_24 = arith.constant dense<0.000000e+00> : vector<8x128xf32>
    %70 = tpu.matmul %63, %15, %cst_24 {dimension_numbers = #tpu.dot_dimension_numbers<[1], [0], [0], [1], [0, 0, 1, 1], [], []>} : vector<8x32xf32>, vector<32x128xf32>, vector<8x128xf32> -> vector<8x128xf32>
    %71 = arith.addf %69, %70 : vector<8x128xf32>
    %72 = arith.negf %71 : vector<8x128xf32>
    %73 = math.exp %72 : vector<8x128xf32>
    %cst_25 = arith.constant 1.000000e+00 : f32
    %74 = vector.broadcast %cst_25 : f32 to vector<8x128xf32>
    %75 = arith.addf %74, %73 : vector<8x128xf32>
    %76 = arith.divf %74, %75 : vector<8x128xf32>
    %77 = math.tanh %71 : vector<8x128xf32>
    %78 = arith.select %5, %77, %76 : vector<8x128xi1>, vector<8x128xf32>
    %79 = vector.extract_strided_slice %78 {offsets = [0, 0], sizes = [8, 32], strides = [1, 1]} : vector<8x128xf32> to vector<8x32xf32>
    %80 = vector.extract_strided_slice %78 {offsets = [0, 32], sizes = [8, 32], strides = [1, 1]} : vector<8x128xf32> to vector<8x32xf32>
    %81 = vector.extract_strided_slice %78 {offsets = [0, 64], sizes = [8, 32], strides = [1, 1]} : vector<8x128xf32> to vector<8x32xf32>
    %82 = vector.extract_strided_slice %78 {offsets = [0, 96], sizes = [8, 32], strides = [1, 1]} : vector<8x128xf32> to vector<8x32xf32>
    %83 = arith.mulf %80, %61 : vector<8x32xf32>
    %84 = arith.mulf %79, %81 : vector<8x32xf32>
    %85 = arith.addf %83, %84 : vector<8x32xf32>
    %86 = math.tanh %85 : vector<8x32xf32>
    %87 = arith.mulf %82, %86 : vector<8x32xf32>
    %88 = arith.index_cast %67 : i32 to index
    %c0_26 = arith.constant 0 : index
    %89 = vector.load %arg10[%88, %c0_26] : memref<64x32xf32, #tpu.memory_space<vmem>>, vector<8x32xf32>
    tpu.vector_store %arg10[%88, %c0_26], %87 {strides = array<i32>} : memref<64x32xf32, #tpu.memory_space<vmem>>, vector<8x32xf32>,
    %c3_i32 = arith.constant 3 : i32
    %c8_i32_27 = arith.constant 8 : i32
    %90 = arith.muli %c3_i32, %c8_i32_27 : i32
    %91 = tpu.assume_multiple %90, 8 : i32
    %92 = arith.index_cast %91 : i32 to index
    %c0_28 = arith.constant 0 : index
    %93 = vector.load %arg11[%92, %c0_28] : memref<64x128xf32, #tpu.memory_space<vmem>>, vector<8x128xf32>
    %cst_29 = arith.constant dense<0.000000e+00> : vector<8x128xf32>
    %94 = tpu.matmul %87, %15, %cst_29 {dimension_numbers = #tpu.dot_dimension_numbers<[1], [0], [0], [1], [0, 0, 1, 1], [], []>} : vector<8x32xf32>, vector<32x128xf32>, vector<8x128xf32> -> vector<8x128xf32>
    %95 = arith.addf %93, %94 : vector<8x128xf32>
    %96 = arith.negf %95 : vector<8x128xf32>
    %97 = math.exp %96 : vector<8x128xf32>
    %cst_30 = arith.constant 1.000000e+00 : f32
    %98 = vector.broadcast %cst_30 : f32 to vector<8x128xf32>
    %99 = arith.addf %98, %97 : vector<8x128xf32>
    %100 = arith.divf %98, %99 : vector<8x128xf32>
    %101 = math.tanh %95 : vector<8x128xf32>
    %102 = arith.select %5, %101, %100 : vector<8x128xi1>, vector<8x128xf32>
    %103 = vector.extract_strided_slice %102 {offsets = [0, 0], sizes = [8, 32], strides = [1, 1]} : vector<8x128xf32> to vector<8x32xf32>
    %104 = vector.extract_strided_slice %102 {offsets = [0, 32], sizes = [8, 32], strides = [1, 1]} : vector<8x128xf32> to vector<8x32xf32>
    %105 = vector.extract_strided_slice %102 {offsets = [0, 64], sizes = [8, 32], strides = [1, 1]} : vector<8x128xf32> to vector<8x32xf32>
    %106 = vector.extract_strided_slice %102 {offsets = [0, 96], sizes = [8, 32], strides = [1, 1]} : vector<8x128xf32> to vector<8x32xf32>
    %107 = arith.mulf %104, %85 : vector<8x32xf32>
    %108 = arith.mulf %103, %105 : vector<8x32xf32>
    %109 = arith.addf %107, %108 : vector<8x32xf32>
    %110 = math.tanh %109 : vector<8x32xf32>
    %111 = arith.mulf %106, %110 : vector<8x32xf32>
    %112 = arith.index_cast %91 : i32 to index
    %c0_31 = arith.constant 0 : index
    %113 = vector.load %arg10[%112, %c0_31] : memref<64x32xf32, #tpu.memory_space<vmem>>, vector<8x32xf32>
    tpu.vector_store %arg10[%112, %c0_31], %111 {strides = array<i32>} : memref<64x32xf32, #tpu.memory_space<vmem>>, vector<8x32xf32>,
    %c4_i32 = arith.constant 4 : i32
    %c8_i32_32 = arith.constant 8 : i32
    %114 = arith.muli %c4_i32, %c8_i32_32 : i32
    %115 = tpu.assume_multiple %114, 8 : i32
    %116 = arith.index_cast %115 : i32 to index
    %c0_33 = arith.constant 0 : index
    %117 = vector.load %arg11[%116, %c0_33] : memref<64x128xf32, #tpu.memory_space<vmem>>, vector<8x128xf32>
    %cst_34 = arith.constant dense<0.000000e+00> : vector<8x128xf32>
    %118 = tpu.matmul %111, %15, %cst_34 {dimension_numbers = #tpu.dot_dimension_numbers<[1], [0], [0], [1], [0, 0, 1, 1], [], []>} : vector<8x32xf32>, vector<32x128xf32>, vector<8x128xf32> -> vector<8x128xf32>
    %119 = arith.addf %117, %118 : vector<8x128xf32>
    %120 = arith.negf %119 : vector<8x128xf32>
    %121 = math.exp %120 : vector<8x128xf32>
    %cst_35 = arith.constant 1.000000e+00 : f32
    %122 = vector.broadcast %cst_35 : f32 to vector<8x128xf32>
    %123 = arith.addf %122, %121 : vector<8x128xf32>
    %124 = arith.divf %122, %123 : vector<8x128xf32>
    %125 = math.tanh %119 : vector<8x128xf32>
    %126 = arith.select %5, %125, %124 : vector<8x128xi1>, vector<8x128xf32>
    %127 = vector.extract_strided_slice %126 {offsets = [0, 0], sizes = [8, 32], strides = [1, 1]} : vector<8x128xf32> to vector<8x32xf32>
    %128 = vector.extract_strided_slice %126 {offsets = [0, 32], sizes = [8, 32], strides = [1, 1]} : vector<8x128xf32> to vector<8x32xf32>
    %129 = vector.extract_strided_slice %126 {offsets = [0, 64], sizes = [8, 32], strides = [1, 1]} : vector<8x128xf32> to vector<8x32xf32>
    %130 = vector.extract_strided_slice %126 {offsets = [0, 96], sizes = [8, 32], strides = [1, 1]} : vector<8x128xf32> to vector<8x32xf32>
    %131 = arith.mulf %128, %109 : vector<8x32xf32>
    %132 = arith.mulf %127, %129 : vector<8x32xf32>
    %133 = arith.addf %131, %132 : vector<8x32xf32>
    %134 = math.tanh %133 : vector<8x32xf32>
    %135 = arith.mulf %130, %134 : vector<8x32xf32>
    %136 = arith.index_cast %115 : i32 to index
    %c0_36 = arith.constant 0 : index
    %137 = vector.load %arg10[%136, %c0_36] : memref<64x32xf32, #tpu.memory_space<vmem>>, vector<8x32xf32>
    tpu.vector_store %arg10[%136, %c0_36], %135 {strides = array<i32>} : memref<64x32xf32, #tpu.memory_space<vmem>>, vector<8x32xf32>,
    %c5_i32 = arith.constant 5 : i32
    %c8_i32_37 = arith.constant 8 : i32
    %138 = arith.muli %c5_i32, %c8_i32_37 : i32
    %139 = tpu.assume_multiple %138, 8 : i32
    %140 = arith.index_cast %139 : i32 to index
    %c0_38 = arith.constant 0 : index
    %141 = vector.load %arg11[%140, %c0_38] : memref<64x128xf32, #tpu.memory_space<vmem>>, vector<8x128xf32>
    %cst_39 = arith.constant dense<0.000000e+00> : vector<8x128xf32>
    %142 = tpu.matmul %135, %15, %cst_39 {dimension_numbers = #tpu.dot_dimension_numbers<[1], [0], [0], [1], [0, 0, 1, 1], [], []>} : vector<8x32xf32>, vector<32x128xf32>, vector<8x128xf32> -> vector<8x128xf32>
    %143 = arith.addf %141, %142 : vector<8x128xf32>
    %144 = arith.negf %143 : vector<8x128xf32>
    %145 = math.exp %144 : vector<8x128xf32>
    %cst_40 = arith.constant 1.000000e+00 : f32
    %146 = vector.broadcast %cst_40 : f32 to vector<8x128xf32>
    %147 = arith.addf %146, %145 : vector<8x128xf32>
    %148 = arith.divf %146, %147 : vector<8x128xf32>
    %149 = math.tanh %143 : vector<8x128xf32>
    %150 = arith.select %5, %149, %148 : vector<8x128xi1>, vector<8x128xf32>
    %151 = vector.extract_strided_slice %150 {offsets = [0, 0], sizes = [8, 32], strides = [1, 1]} : vector<8x128xf32> to vector<8x32xf32>
    %152 = vector.extract_strided_slice %150 {offsets = [0, 32], sizes = [8, 32], strides = [1, 1]} : vector<8x128xf32> to vector<8x32xf32>
    %153 = vector.extract_strided_slice %150 {offsets = [0, 64], sizes = [8, 32], strides = [1, 1]} : vector<8x128xf32> to vector<8x32xf32>
    %154 = vector.extract_strided_slice %150 {offsets = [0, 96], sizes = [8, 32], strides = [1, 1]} : vector<8x128xf32> to vector<8x32xf32>
    %155 = arith.mulf %152, %133 : vector<8x32xf32>
    %156 = arith.mulf %151, %153 : vector<8x32xf32>
    %157 = arith.addf %155, %156 : vector<8x32xf32>
    %158 = math.tanh %157 : vector<8x32xf32>
    %159 = arith.mulf %154, %158 : vector<8x32xf32>
    %160 = arith.index_cast %139 : i32 to index
    %c0_41 = arith.constant 0 : index
    %161 = vector.load %arg10[%160, %c0_41] : memref<64x32xf32, #tpu.memory_space<vmem>>, vector<8x32xf32>
    tpu.vector_store %arg10[%160, %c0_41], %159 {strides = array<i32>} : memref<64x32xf32, #tpu.memory_space<vmem>>, vector<8x32xf32>,
    %c6_i32 = arith.constant 6 : i32
    %c8_i32_42 = arith.constant 8 : i32
    %162 = arith.muli %c6_i32, %c8_i32_42 : i32
    %163 = tpu.assume_multiple %162, 8 : i32
    %164 = arith.index_cast %163 : i32 to index
    %c0_43 = arith.constant 0 : index
    %165 = vector.load %arg11[%164, %c0_43] : memref<64x128xf32, #tpu.memory_space<vmem>>, vector<8x128xf32>
    %cst_44 = arith.constant dense<0.000000e+00> : vector<8x128xf32>
    %166 = tpu.matmul %159, %15, %cst_44 {dimension_numbers = #tpu.dot_dimension_numbers<[1], [0], [0], [1], [0, 0, 1, 1], [], []>} : vector<8x32xf32>, vector<32x128xf32>, vector<8x128xf32> -> vector<8x128xf32>
    %167 = arith.addf %165, %166 : vector<8x128xf32>
    %168 = arith.negf %167 : vector<8x128xf32>
    %169 = math.exp %168 : vector<8x128xf32>
    %cst_45 = arith.constant 1.000000e+00 : f32
    %170 = vector.broadcast %cst_45 : f32 to vector<8x128xf32>
    %171 = arith.addf %170, %169 : vector<8x128xf32>
    %172 = arith.divf %170, %171 : vector<8x128xf32>
    %173 = math.tanh %167 : vector<8x128xf32>
    %174 = arith.select %5, %173, %172 : vector<8x128xi1>, vector<8x128xf32>
    %175 = vector.extract_strided_slice %174 {offsets = [0, 0], sizes = [8, 32], strides = [1, 1]} : vector<8x128xf32> to vector<8x32xf32>
    %176 = vector.extract_strided_slice %174 {offsets = [0, 32], sizes = [8, 32], strides = [1, 1]} : vector<8x128xf32> to vector<8x32xf32>
    %177 = vector.extract_strided_slice %174 {offsets = [0, 64], sizes = [8, 32], strides = [1, 1]} : vector<8x128xf32> to vector<8x32xf32>
    %178 = vector.extract_strided_slice %174 {offsets = [0, 96], sizes = [8, 32], strides = [1, 1]} : vector<8x128xf32> to vector<8x32xf32>
    %179 = arith.mulf %176, %157 : vector<8x32xf32>
    %180 = arith.mulf %175, %177 : vector<8x32xf32>
    %181 = arith.addf %179, %180 : vector<8x32xf32>
    %182 = math.tanh %181 : vector<8x32xf32>
    %183 = arith.mulf %178, %182 : vector<8x32xf32>
    %184 = arith.index_cast %163 : i32 to index
    %c0_46 = arith.constant 0 : index
    %185 = vector.load %arg10[%184, %c0_46] : memref<64x32xf32, #tpu.memory_space<vmem>>, vector<8x32xf32>
    tpu.vector_store %arg10[%184, %c0_46], %183 {strides = array<i32>} : memref<64x32xf32, #tpu.memory_space<vmem>>, vector<8x32xf32>,
    %c7_i32 = arith.constant 7 : i32
    %c8_i32_47 = arith.constant 8 : i32
    %186 = arith.muli %c7_i32, %c8_i32_47 : i32
    %187 = tpu.assume_multiple %186, 8 : i32
    %188 = arith.index_cast %187 : i32 to index
    %c0_48 = arith.constant 0 : index
    %189 = vector.load %arg11[%188, %c0_48] : memref<64x128xf32, #tpu.memory_space<vmem>>, vector<8x128xf32>
    %cst_49 = arith.constant dense<0.000000e+00> : vector<8x128xf32>
    %190 = tpu.matmul %183, %15, %cst_49 {dimension_numbers = #tpu.dot_dimension_numbers<[1], [0], [0], [1], [0, 0, 1, 1], [], []>} : vector<8x32xf32>, vector<32x128xf32>, vector<8x128xf32> -> vector<8x128xf32>
    %191 = arith.addf %189, %190 : vector<8x128xf32>
    %192 = arith.negf %191 : vector<8x128xf32>
    %193 = math.exp %192 : vector<8x128xf32>
    %cst_50 = arith.constant 1.000000e+00 : f32
    %194 = vector.broadcast %cst_50 : f32 to vector<8x128xf32>
    %195 = arith.addf %194, %193 : vector<8x128xf32>
    %196 = arith.divf %194, %195 : vector<8x128xf32>
    %197 = math.tanh %191 : vector<8x128xf32>
    %198 = arith.select %5, %197, %196 : vector<8x128xi1>, vector<8x128xf32>
    %199 = vector.extract_strided_slice %198 {offsets = [0, 0], sizes = [8, 32], strides = [1, 1]} : vector<8x128xf32> to vector<8x32xf32>
    %200 = vector.extract_strided_slice %198 {offsets = [0, 32], sizes = [8, 32], strides = [1, 1]} : vector<8x128xf32> to vector<8x32xf32>
    %201 = vector.extract_strided_slice %198 {offsets = [0, 64], sizes = [8, 32], strides = [1, 1]} : vector<8x128xf32> to vector<8x32xf32>
    %202 = vector.extract_strided_slice %198 {offsets = [0, 96], sizes = [8, 32], strides = [1, 1]} : vector<8x128xf32> to vector<8x32xf32>
    %203 = arith.mulf %200, %181 : vector<8x32xf32>
    %204 = arith.mulf %199, %201 : vector<8x32xf32>
    %205 = arith.addf %203, %204 : vector<8x32xf32>
    %206 = math.tanh %205 : vector<8x32xf32>
    %207 = arith.mulf %202, %206 : vector<8x32xf32>
    %208 = arith.index_cast %187 : i32 to index
    %c0_51 = arith.constant 0 : index
    %209 = vector.load %arg10[%208, %c0_51] : memref<64x32xf32, #tpu.memory_space<vmem>>, vector<8x32xf32>
    tpu.vector_store %arg10[%208, %c0_51], %207 {strides = array<i32>} : memref<64x32xf32, #tpu.memory_space<vmem>>, vector<8x32xf32>,
    %c8_i32_52 = arith.constant 8 : i32
    %c0_53 = arith.constant 0 : index
    %c0_54 = arith.constant 0 : index
    %210 = vector.load %arg10[%c0_53, %c0_54] : memref<64x32xf32, #tpu.memory_space<vmem>>, vector<64x32xf32>
    %c0_55 = arith.constant 0 : index
    %c0_56 = arith.constant 0 : index
    %c0_57 = arith.constant 0 : index
    %211 = vector.load %arg2[%c0_55, %c0_56, %c0_57] : memref<1x32x128xf32, #tpu.memory_space<vmem>>, vector<1x32x128xf32>
    %212 = vector.shape_cast %211 : vector<1x32x128xf32> to vector<32x128xf32>
    %cst_58 = arith.constant dense<0.000000e+00> : vector<64x128xf32>
    %213 = tpu.matmul %210, %212, %cst_58 {dimension_numbers = #tpu.dot_dimension_numbers<[1], [0], [0], [1], [0, 0, 1, 1], [], []>} : vector<64x32xf32>, vector<32x128xf32>, vector<64x128xf32> -> vector<64x128xf32>
    %c1 = arith.constant 1 : index
    %c0_59 = arith.constant 0 : index
    %c0_60 = arith.constant 0 : index
    %214 = vector.load %arg4[%c1, %c0_59, %c0_60] : memref<2x1x128xf32, #tpu.memory_space<vmem>>, vector<1x1x128xf32>
    %215 = vector.shape_cast %214 : vector<1x1x128xf32> to vector<1x128xf32>
    %216 = vector.broadcast %215 : vector<1x128xf32> to vector<64x128xf32>
    %217 = arith.addf %213, %216 : vector<64x128xf32>
    %c0_61 = arith.constant 0 : index
    %c0_62 = arith.constant 0 : index
    %218 = vector.load %arg11[%c0_61, %c0_62] : memref<64x128xf32, #tpu.memory_space<vmem>>, vector<64x128xf32>
    tpu.vector_store %arg11[%c0_61, %c0_62], %217 {strides = array<i32>} : memref<64x128xf32, #tpu.memory_space<vmem>>, vector<64x128xf32>,
    %c1_63 = arith.constant 1 : index
    %c0_64 = arith.constant 0 : index
    %c0_65 = arith.constant 0 : index
    %219 = vector.load %arg3[%c1_63, %c0_64, %c0_65] : memref<2x32x128xf32, #tpu.memory_space<vmem>>, vector<1x32x128xf32>
    %220 = vector.shape_cast %219 : vector<1x32x128xf32> to vector<32x128xf32>
    %cst_66 = arith.constant 0.000000e+00 : f32
    %221 = vector.broadcast %cst_66 : f32 to vector<8x32xf32>
    %cst_67 = arith.constant 0.000000e+00 : f32
    %222 = vector.broadcast %cst_67 : f32 to vector<8x32xf32>
    %c0_i32_68 = arith.constant 0 : i32
    %c8_i32_69 = arith.constant 8 : i32
    %223 = arith.muli %c0_i32_68, %c8_i32_69 : i32
    %224 = tpu.assume_multiple %223, 8 : i32
    %225 = arith.index_cast %224 : i32 to index
    %c0_70 = arith.constant 0 : index
    %226 = vector.load %arg11[%225, %c0_70] : memref<64x128xf32, #tpu.memory_space<vmem>>, vector<8x128xf32>
    %cst_71 = arith.constant dense<0.000000e+00> : vector<8x128xf32>
    %227 = tpu.matmul %221, %220, %cst_71 {dimension_numbers = #tpu.dot_dimension_numbers<[1], [0], [0], [1], [0, 0, 1, 1], [], []>} : vector<8x32xf32>, vector<32x128xf32>, vector<8x128xf32> -> vector<8x128xf32>
    %228 = arith.addf %226, %227 : vector<8x128xf32>
    %229 = arith.negf %228 : vector<8x128xf32>
    %230 = math.exp %229 : vector<8x128xf32>
    %cst_72 = arith.constant 1.000000e+00 : f32
    %231 = vector.broadcast %cst_72 : f32 to vector<8x128xf32>
    %232 = arith.addf %231, %230 : vector<8x128xf32>
    %233 = arith.divf %231, %232 : vector<8x128xf32>
    %234 = math.tanh %228 : vector<8x128xf32>
    %235 = arith.select %5, %234, %233 : vector<8x128xi1>, vector<8x128xf32>
    %236 = vector.extract_strided_slice %235 {offsets = [0, 0], sizes = [8, 32], strides = [1, 1]} : vector<8x128xf32> to vector<8x32xf32>
    %237 = vector.extract_strided_slice %235 {offsets = [0, 32], sizes = [8, 32], strides = [1, 1]} : vector<8x128xf32> to vector<8x32xf32>
    %238 = vector.extract_strided_slice %235 {offsets = [0, 64], sizes = [8, 32], strides = [1, 1]} : vector<8x128xf32> to vector<8x32xf32>
    %239 = vector.extract_strided_slice %235 {offsets = [0, 96], sizes = [8, 32], strides = [1, 1]} : vector<8x128xf32> to vector<8x32xf32>
    %240 = arith.mulf %237, %222 : vector<8x32xf32>
    %241 = arith.mulf %236, %238 : vector<8x32xf32>
    %242 = arith.addf %240, %241 : vector<8x32xf32>
    %243 = math.tanh %242 : vector<8x32xf32>
    %244 = arith.mulf %239, %243 : vector<8x32xf32>
    %c1_i32_73 = arith.constant 1 : i32
    %c8_i32_74 = arith.constant 8 : i32
    %245 = arith.muli %c1_i32_73, %c8_i32_74 : i32
    %246 = tpu.assume_multiple %245, 8 : i32
    %247 = arith.index_cast %246 : i32 to index
    %c0_75 = arith.constant 0 : index
    %248 = vector.load %arg11[%247, %c0_75] : memref<64x128xf32, #tpu.memory_space<vmem>>, vector<8x128xf32>
    %cst_76 = arith.constant dense<0.000000e+00> : vector<8x128xf32>
    %249 = tpu.matmul %244, %220, %cst_76 {dimension_numbers = #tpu.dot_dimension_numbers<[1], [0], [0], [1], [0, 0, 1, 1], [], []>} : vector<8x32xf32>, vector<32x128xf32>, vector<8x128xf32> -> vector<8x128xf32>
    %250 = arith.addf %248, %249 : vector<8x128xf32>
    %251 = arith.negf %250 : vector<8x128xf32>
    %252 = math.exp %251 : vector<8x128xf32>
    %cst_77 = arith.constant 1.000000e+00 : f32
    %253 = vector.broadcast %cst_77 : f32 to vector<8x128xf32>
    %254 = arith.addf %253, %252 : vector<8x128xf32>
    %255 = arith.divf %253, %254 : vector<8x128xf32>
    %256 = math.tanh %250 : vector<8x128xf32>
    %257 = arith.select %5, %256, %255 : vector<8x128xi1>, vector<8x128xf32>
    %258 = vector.extract_strided_slice %257 {offsets = [0, 0], sizes = [8, 32], strides = [1, 1]} : vector<8x128xf32> to vector<8x32xf32>
    %259 = vector.extract_strided_slice %257 {offsets = [0, 32], sizes = [8, 32], strides = [1, 1]} : vector<8x128xf32> to vector<8x32xf32>
    %260 = vector.extract_strided_slice %257 {offsets = [0, 64], sizes = [8, 32], strides = [1, 1]} : vector<8x128xf32> to vector<8x32xf32>
    %261 = vector.extract_strided_slice %257 {offsets = [0, 96], sizes = [8, 32], strides = [1, 1]} : vector<8x128xf32> to vector<8x32xf32>
    %262 = arith.mulf %259, %242 : vector<8x32xf32>
    %263 = arith.mulf %258, %260 : vector<8x32xf32>
    %264 = arith.addf %262, %263 : vector<8x32xf32>
    %265 = math.tanh %264 : vector<8x32xf32>
    %266 = arith.mulf %261, %265 : vector<8x32xf32>
    %c2_i32_78 = arith.constant 2 : i32
    %c8_i32_79 = arith.constant 8 : i32
    %267 = arith.muli %c2_i32_78, %c8_i32_79 : i32
    %268 = tpu.assume_multiple %267, 8 : i32
    %269 = arith.index_cast %268 : i32 to index
    %c0_80 = arith.constant 0 : index
    %270 = vector.load %arg11[%269, %c0_80] : memref<64x128xf32, #tpu.memory_space<vmem>>, vector<8x128xf32>
    %cst_81 = arith.constant dense<0.000000e+00> : vector<8x128xf32>
    %271 = tpu.matmul %266, %220, %cst_81 {dimension_numbers = #tpu.dot_dimension_numbers<[1], [0], [0], [1], [0, 0, 1, 1], [], []>} : vector<8x32xf32>, vector<32x128xf32>, vector<8x128xf32> -> vector<8x128xf32>
    %272 = arith.addf %270, %271 : vector<8x128xf32>
    %273 = arith.negf %272 : vector<8x128xf32>
    %274 = math.exp %273 : vector<8x128xf32>
    %cst_82 = arith.constant 1.000000e+00 : f32
    %275 = vector.broadcast %cst_82 : f32 to vector<8x128xf32>
    %276 = arith.addf %275, %274 : vector<8x128xf32>
    %277 = arith.divf %275, %276 : vector<8x128xf32>
    %278 = math.tanh %272 : vector<8x128xf32>
    %279 = arith.select %5, %278, %277 : vector<8x128xi1>, vector<8x128xf32>
    %280 = vector.extract_strided_slice %279 {offsets = [0, 0], sizes = [8, 32], strides = [1, 1]} : vector<8x128xf32> to vector<8x32xf32>
    %281 = vector.extract_strided_slice %279 {offsets = [0, 32], sizes = [8, 32], strides = [1, 1]} : vector<8x128xf32> to vector<8x32xf32>
    %282 = vector.extract_strided_slice %279 {offsets = [0, 64], sizes = [8, 32], strides = [1, 1]} : vector<8x128xf32> to vector<8x32xf32>
    %283 = vector.extract_strided_slice %279 {offsets = [0, 96], sizes = [8, 32], strides = [1, 1]} : vector<8x128xf32> to vector<8x32xf32>
    %284 = arith.mulf %281, %264 : vector<8x32xf32>
    %285 = arith.mulf %280, %282 : vector<8x32xf32>
    %286 = arith.addf %284, %285 : vector<8x32xf32>
    %287 = math.tanh %286 : vector<8x32xf32>
    %288 = arith.mulf %283, %287 : vector<8x32xf32>
    %c3_i32_83 = arith.constant 3 : i32
    %c8_i32_84 = arith.constant 8 : i32
    %289 = arith.muli %c3_i32_83, %c8_i32_84 : i32
    %290 = tpu.assume_multiple %289, 8 : i32
    %291 = arith.index_cast %290 : i32 to index
    %c0_85 = arith.constant 0 : index
    %292 = vector.load %arg11[%291, %c0_85] : memref<64x128xf32, #tpu.memory_space<vmem>>, vector<8x128xf32>
    %cst_86 = arith.constant dense<0.000000e+00> : vector<8x128xf32>
    %293 = tpu.matmul %288, %220, %cst_86 {dimension_numbers = #tpu.dot_dimension_numbers<[1], [0], [0], [1], [0, 0, 1, 1], [], []>} : vector<8x32xf32>, vector<32x128xf32>, vector<8x128xf32> -> vector<8x128xf32>
    %294 = arith.addf %292, %293 : vector<8x128xf32>
    %295 = arith.negf %294 : vector<8x128xf32>
    %296 = math.exp %295 : vector<8x128xf32>
    %cst_87 = arith.constant 1.000000e+00 : f32
    %297 = vector.broadcast %cst_87 : f32 to vector<8x128xf32>
    %298 = arith.addf %297, %296 : vector<8x128xf32>
    %299 = arith.divf %297, %298 : vector<8x128xf32>
    %300 = math.tanh %294 : vector<8x128xf32>
    %301 = arith.select %5, %300, %299 : vector<8x128xi1>, vector<8x128xf32>
    %302 = vector.extract_strided_slice %301 {offsets = [0, 0], sizes = [8, 32], strides = [1, 1]} : vector<8x128xf32> to vector<8x32xf32>
    %303 = vector.extract_strided_slice %301 {offsets = [0, 32], sizes = [8, 32], strides = [1, 1]} : vector<8x128xf32> to vector<8x32xf32>
    %304 = vector.extract_strided_slice %301 {offsets = [0, 64], sizes = [8, 32], strides = [1, 1]} : vector<8x128xf32> to vector<8x32xf32>
    %305 = vector.extract_strided_slice %301 {offsets = [0, 96], sizes = [8, 32], strides = [1, 1]} : vector<8x128xf32> to vector<8x32xf32>
    %306 = arith.mulf %303, %286 : vector<8x32xf32>
    %307 = arith.mulf %302, %304 : vector<8x32xf32>
    %308 = arith.addf %306, %307 : vector<8x32xf32>
    %309 = math.tanh %308 : vector<8x32xf32>
    %310 = arith.mulf %305, %309 : vector<8x32xf32>
    %c4_i32_88 = arith.constant 4 : i32
    %c8_i32_89 = arith.constant 8 : i32
    %311 = arith.muli %c4_i32_88, %c8_i32_89 : i32
    %312 = tpu.assume_multiple %311, 8 : i32
    %313 = arith.index_cast %312 : i32 to index
    %c0_90 = arith.constant 0 : index
    %314 = vector.load %arg11[%313, %c0_90] : memref<64x128xf32, #tpu.memory_space<vmem>>, vector<8x128xf32>
    %cst_91 = arith.constant dense<0.000000e+00> : vector<8x128xf32>
    %315 = tpu.matmul %310, %220, %cst_91 {dimension_numbers = #tpu.dot_dimension_numbers<[1], [0], [0], [1], [0, 0, 1, 1], [], []>} : vector<8x32xf32>, vector<32x128xf32>, vector<8x128xf32> -> vector<8x128xf32>
    %316 = arith.addf %314, %315 : vector<8x128xf32>
    %317 = arith.negf %316 : vector<8x128xf32>
    %318 = math.exp %317 : vector<8x128xf32>
    %cst_92 = arith.constant 1.000000e+00 : f32
    %319 = vector.broadcast %cst_92 : f32 to vector<8x128xf32>
    %320 = arith.addf %319, %318 : vector<8x128xf32>
    %321 = arith.divf %319, %320 : vector<8x128xf32>
    %322 = math.tanh %316 : vector<8x128xf32>
    %323 = arith.select %5, %322, %321 : vector<8x128xi1>, vector<8x128xf32>
    %324 = vector.extract_strided_slice %323 {offsets = [0, 0], sizes = [8, 32], strides = [1, 1]} : vector<8x128xf32> to vector<8x32xf32>
    %325 = vector.extract_strided_slice %323 {offsets = [0, 32], sizes = [8, 32], strides = [1, 1]} : vector<8x128xf32> to vector<8x32xf32>
    %326 = vector.extract_strided_slice %323 {offsets = [0, 64], sizes = [8, 32], strides = [1, 1]} : vector<8x128xf32> to vector<8x32xf32>
    %327 = vector.extract_strided_slice %323 {offsets = [0, 96], sizes = [8, 32], strides = [1, 1]} : vector<8x128xf32> to vector<8x32xf32>
    %328 = arith.mulf %325, %308 : vector<8x32xf32>
    %329 = arith.mulf %324, %326 : vector<8x32xf32>
    %330 = arith.addf %328, %329 : vector<8x32xf32>
    %331 = math.tanh %330 : vector<8x32xf32>
    %332 = arith.mulf %327, %331 : vector<8x32xf32>
    %c5_i32_93 = arith.constant 5 : i32
    %c8_i32_94 = arith.constant 8 : i32
    %333 = arith.muli %c5_i32_93, %c8_i32_94 : i32
    %334 = tpu.assume_multiple %333, 8 : i32
    %335 = arith.index_cast %334 : i32 to index
    %c0_95 = arith.constant 0 : index
    %336 = vector.load %arg11[%335, %c0_95] : memref<64x128xf32, #tpu.memory_space<vmem>>, vector<8x128xf32>
    %cst_96 = arith.constant dense<0.000000e+00> : vector<8x128xf32>
    %337 = tpu.matmul %332, %220, %cst_96 {dimension_numbers = #tpu.dot_dimension_numbers<[1], [0], [0], [1], [0, 0, 1, 1], [], []>} : vector<8x32xf32>, vector<32x128xf32>, vector<8x128xf32> -> vector<8x128xf32>
    %338 = arith.addf %336, %337 : vector<8x128xf32>
    %339 = arith.negf %338 : vector<8x128xf32>
    %340 = math.exp %339 : vector<8x128xf32>
    %cst_97 = arith.constant 1.000000e+00 : f32
    %341 = vector.broadcast %cst_97 : f32 to vector<8x128xf32>
    %342 = arith.addf %341, %340 : vector<8x128xf32>
    %343 = arith.divf %341, %342 : vector<8x128xf32>
    %344 = math.tanh %338 : vector<8x128xf32>
    %345 = arith.select %5, %344, %343 : vector<8x128xi1>, vector<8x128xf32>
    %346 = vector.extract_strided_slice %345 {offsets = [0, 0], sizes = [8, 32], strides = [1, 1]} : vector<8x128xf32> to vector<8x32xf32>
    %347 = vector.extract_strided_slice %345 {offsets = [0, 32], sizes = [8, 32], strides = [1, 1]} : vector<8x128xf32> to vector<8x32xf32>
    %348 = vector.extract_strided_slice %345 {offsets = [0, 64], sizes = [8, 32], strides = [1, 1]} : vector<8x128xf32> to vector<8x32xf32>
    %349 = vector.extract_strided_slice %345 {offsets = [0, 96], sizes = [8, 32], strides = [1, 1]} : vector<8x128xf32> to vector<8x32xf32>
    %350 = arith.mulf %347, %330 : vector<8x32xf32>
    %351 = arith.mulf %346, %348 : vector<8x32xf32>
    %352 = arith.addf %350, %351 : vector<8x32xf32>
    %353 = math.tanh %352 : vector<8x32xf32>
    %354 = arith.mulf %349, %353 : vector<8x32xf32>
    %c6_i32_98 = arith.constant 6 : i32
    %c8_i32_99 = arith.constant 8 : i32
    %355 = arith.muli %c6_i32_98, %c8_i32_99 : i32
    %356 = tpu.assume_multiple %355, 8 : i32
    %357 = arith.index_cast %356 : i32 to index
    %c0_100 = arith.constant 0 : index
    %358 = vector.load %arg11[%357, %c0_100] : memref<64x128xf32, #tpu.memory_space<vmem>>, vector<8x128xf32>
    %cst_101 = arith.constant dense<0.000000e+00> : vector<8x128xf32>
    %359 = tpu.matmul %354, %220, %cst_101 {dimension_numbers = #tpu.dot_dimension_numbers<[1], [0], [0], [1], [0, 0, 1, 1], [], []>} : vector<8x32xf32>, vector<32x128xf32>, vector<8x128xf32> -> vector<8x128xf32>
    %360 = arith.addf %358, %359 : vector<8x128xf32>
    %361 = arith.negf %360 : vector<8x128xf32>
    %362 = math.exp %361 : vector<8x128xf32>
    %cst_102 = arith.constant 1.000000e+00 : f32
    %363 = vector.broadcast %cst_102 : f32 to vector<8x128xf32>
    %364 = arith.addf %363, %362 : vector<8x128xf32>
    %365 = arith.divf %363, %364 : vector<8x128xf32>
    %366 = math.tanh %360 : vector<8x128xf32>
    %367 = arith.select %5, %366, %365 : vector<8x128xi1>, vector<8x128xf32>
    %368 = vector.extract_strided_slice %367 {offsets = [0, 0], sizes = [8, 32], strides = [1, 1]} : vector<8x128xf32> to vector<8x32xf32>
    %369 = vector.extract_strided_slice %367 {offsets = [0, 32], sizes = [8, 32], strides = [1, 1]} : vector<8x128xf32> to vector<8x32xf32>
    %370 = vector.extract_strided_slice %367 {offsets = [0, 64], sizes = [8, 32], strides = [1, 1]} : vector<8x128xf32> to vector<8x32xf32>
    %371 = vector.extract_strided_slice %367 {offsets = [0, 96], sizes = [8, 32], strides = [1, 1]} : vector<8x128xf32> to vector<8x32xf32>
    %372 = arith.mulf %369, %352 : vector<8x32xf32>
    %373 = arith.mulf %368, %370 : vector<8x32xf32>
    %374 = arith.addf %372, %373 : vector<8x32xf32>
    %375 = math.tanh %374 : vector<8x32xf32>
    %376 = arith.mulf %371, %375 : vector<8x32xf32>
    %c7_i32_103 = arith.constant 7 : i32
    %c8_i32_104 = arith.constant 8 : i32
    %377 = arith.muli %c7_i32_103, %c8_i32_104 : i32
    %378 = tpu.assume_multiple %377, 8 : i32
    %379 = arith.index_cast %378 : i32 to index
    %c0_105 = arith.constant 0 : index
    %380 = vector.load %arg11[%379, %c0_105] : memref<64x128xf32, #tpu.memory_space<vmem>>, vector<8x128xf32>
    %cst_106 = arith.constant dense<0.000000e+00> : vector<8x128xf32>
    %381 = tpu.matmul %376, %220, %cst_106 {dimension_numbers = #tpu.dot_dimension_numbers<[1], [0], [0], [1], [0, 0, 1, 1], [], []>} : vector<8x32xf32>, vector<32x128xf32>, vector<8x128xf32> -> vector<8x128xf32>
    %382 = arith.addf %380, %381 : vector<8x128xf32>
    %383 = arith.negf %382 : vector<8x128xf32>
    %384 = math.exp %383 : vector<8x128xf32>
    %cst_107 = arith.constant 1.000000e+00 : f32
    %385 = vector.broadcast %cst_107 : f32 to vector<8x128xf32>
    %386 = arith.addf %385, %384 : vector<8x128xf32>
    %387 = arith.divf %385, %386 : vector<8x128xf32>
    %388 = math.tanh %382 : vector<8x128xf32>
    %389 = arith.select %5, %388, %387 : vector<8x128xi1>, vector<8x128xf32>
    %390 = vector.extract_strided_slice %389 {offsets = [0, 0], sizes = [8, 32], strides = [1, 1]} : vector<8x128xf32> to vector<8x32xf32>
    %391 = vector.extract_strided_slice %389 {offsets = [0, 32], sizes = [8, 32], strides = [1, 1]} : vector<8x128xf32> to vector<8x32xf32>
    %392 = vector.extract_strided_slice %389 {offsets = [0, 64], sizes = [8, 32], strides = [1, 1]} : vector<8x128xf32> to vector<8x32xf32>
    %393 = vector.extract_strided_slice %389 {offsets = [0, 96], sizes = [8, 32], strides = [1, 1]} : vector<8x128xf32> to vector<8x32xf32>
    %394 = arith.mulf %391, %374 : vector<8x32xf32>
    %395 = arith.mulf %390, %392 : vector<8x32xf32>
    %396 = arith.addf %394, %395 : vector<8x32xf32>
    %397 = math.tanh %396 : vector<8x32xf32>
    %398 = arith.mulf %393, %397 : vector<8x32xf32>
    %c8_i32_108 = arith.constant 8 : i32
    %c0_109 = arith.constant 0 : index
    %c0_110 = arith.constant 0 : index
    %399 = vector.load %arg5[%c0_109, %c0_110] : memref<32x128xf32, #tpu.memory_space<vmem>>, vector<32x128xf32>
    %cst_111 = arith.constant dense<0.000000e+00> : vector<8x128xf32>
    %400 = tpu.matmul %398, %399, %cst_111 {dimension_numbers = #tpu.dot_dimension_numbers<[1], [0], [0], [1], [0, 0, 1, 1], [], []>} : vector<8x32xf32>, vector<32x128xf32>, vector<8x128xf32> -> vector<8x128xf32>
    %c0_112 = arith.constant 0 : index
    %c0_113 = arith.constant 0 : index
    %401 = vector.load %arg6[%c0_112, %c0_113] : memref<1x128xf32, #tpu.memory_space<vmem>>, vector<1x128xf32>
    %402 = vector.broadcast %401 : vector<1x128xf32> to vector<8x128xf32>
    %403 = arith.addf %400, %402 : vector<8x128xf32>
    %cst_114 = arith.constant 0.000000e+00 : f32
    %404 = vector.broadcast %cst_114 : f32 to vector<8x128xf32>
    %405 = arith.maximumf %403, %404 : vector<8x128xf32>
    %c0_115 = arith.constant 0 : index
    %c0_116 = arith.constant 0 : index
    %406 = vector.load %arg7[%c0_115, %c0_116] : memref<128x128xf32, #tpu.memory_space<vmem>>, vector<128x128xf32>
    %cst_117 = arith.constant dense<0.000000e+00> : vector<8x128xf32>
    %407 = tpu.matmul %405, %406, %cst_117 {dimension_numbers = #tpu.dot_dimension_numbers<[1], [0], [0], [1], [0, 0, 1, 1], [], []>} : vector<8x128xf32>, vector<128x128xf32>, vector<8x128xf32> -> vector<8x128xf32>
    %c0_118 = arith.constant 0 : index
    %c0_119 = arith.constant 0 : index
    %408 = vector.load %arg8[%c0_118, %c0_119] : memref<1x128xf32, #tpu.memory_space<vmem>>, vector<1x128xf32>
    %409 = vector.broadcast %408 : vector<1x128xf32> to vector<8x128xf32>
    %410 = arith.addf %407, %409 : vector<8x128xf32>
    %c0_120 = arith.constant 0 : index
    %c0_121 = arith.constant 0 : index
    %411 = vector.load %arg9[%c0_120, %c0_121] : memref<8x128xf32, #tpu.memory_space<vmem>>, vector<8x128xf32>
    tpu.vector_store %arg9[%c0_120, %c0_121], %410 {strides = array<i32>} : memref<8x128xf32, #tpu.memory_space<vmem>>, vector<8x128xf32>,
    return
  }
}

</mosaic_0001>

<bundles_post_ra>
// kernel: lstm_model_forward.1
= control target key start
LH: loop header
LB: loop body
LE: loop exit
PB: predicated region body
PF: predicated region fallthrough
CT: control target
= control target key end

     0   :  { %14 = vsyncpa [#allocation5], 0  ;;  %s3634_s0 = inlined_call_operand.vmem [shape: f32[64,128], index: 0, kind: input, shape index: {}]   ;;  %s3635_s1 = inlined_call_operand.vmem [shape: f32[128,128], index: 1, kind: input, shape index: {}]   ;;  %s3636_s2 = inlined_call_operand.hbm [shape: f32[1,32,128], index: 2, kind: input, shape index: {}]   ;;  %s3637_s3 = inlined_call_operand.hbm [shape: f32[2,32,128], index: 3, kind: input, shape index: {}]   ;;  %s3638_s4 = inlined_call_operand.vmem [shape: f32[2,1,128], index: 4, kind: input, shape index: {}]   ;;  %s3639_s5 = inlined_call_operand.hbm [shape: f32[32,128], index: 5, kind: input, shape index: {}]   ;;  %s3640_s6 = inlined_call_operand.vmem [shape: f32[1,128], index: 6, kind: input, shape index: {}]   ;;  %s3641_s7 = inlined_call_operand.hbm [shape: f32[128,128], index: 7, kind: input, shape index: {}]   ;;  %s3642_s8 = inlined_call_operand.vmem [shape: f32[1,128], index: 8, kind: input, shape index: {}]   ;;  %s3643_s9 = inlined_call_operand.vmem [shape: f32[8,128], index: 9, kind: output, shape index: {}]  }
   0x1   :  { %15 = vsyncpa [#allocation7], 0 }
   0x2   :  { %16 = vsyncpa [#allocation10], 0  ;;  %s3116_s30 = smov [#allocation6]   ;;  %s3117_s11 = smov [#allocation4]  }
   0x3   :  { %s38_s10 = sshll.u32 %s3116_s30, 4  ;;  %s26_s12 = sshll.u32 %s3117_s11, 4  ;;  %s39_s10 = int_to_ptr.vmem [resolvable:$true] %s38_s10  ;;  %s3177_s12 = int_to_ptr.vmem [resolvable:$true] %s26_s12 }
   0x4   :  { %s3022_s15 = scalar_lea.hbm %s3637_s3, 1024 }
   0x5   :  { %p3023_p0 = scmp.ne.s32.totalorder %s3637_s3, %s3022_s15  ;;  %p3026_p1 = scmp.lt.u32.totalorder %s3022_s15, %s3637_s3 }
   0x7   :  { %p3028_p2 = pnand %p3026_p1, %p3023_p0 }
   0x9   :  { %3031 = shalt.err (!%p3028_p2)
}
   0xa   :  { %s3032_s20 = scalar_lea.vmem %s39_s10, 1024  ;;  %p3037_p4 = scmp.lt.s32.totalorder %s39_s10, %s39_s10 }
   0xb   :  { %p3033_p3 = scmp.ne.s32.totalorder %s39_s10, %s3032_s20  ;;  %p3038_p5 = scmp.lt.s32.totalorder %s3032_s20, %s3032_s20 }
   0xd   :  { %p3039_p6 = por %p3038_p5, %p3037_p4 }
   0xf   :  { %p3040_p7 = pnand %p3039_p6, %p3033_p3 }
  0x11   :  { %3043 = shalt.err (!%p3040_p7)
}
  0x12   :  { %s3118_s21 = smov 128   ;;  %s3119_s22 = smov 8  }
  0x13   :  { %44 = dma.hbm_to_vmem [thread:$0]  %s3637_s3, 1024, %s39_s10, [#allocation7], %s3118_s21, %s3118_s21, %s3119_s22  }
  0x14   :  { %s3044_s27 = scalar_lea.hbm %s3636_s2, 512 }
  0x15   :  { %p3045_p8 = scmp.ne.s32.totalorder %s3636_s2, %s3044_s27  ;;  %p3048_p9 = scmp.lt.u32.totalorder %s3044_s27, %s3636_s2 }
  0x17   :  { %p3050_p10 = pnand %p3048_p9, %p3045_p8 }
  0x19   :  { %3053 = shalt.err (!%p3050_p10)
}
  0x1a   :  { %s3054_s13 = scalar_lea.vmem %s3177_s12, 512  ;;  %p3059_p12 = scmp.lt.s32.totalorder %s3177_s12, %s3177_s12 }
  0x1b   :  { %p3055_p11 = scmp.ne.s32.totalorder %s3177_s12, %s3054_s13  ;;  %p3060_p13 = scmp.lt.s32.totalorder %s3054_s13, %s3054_s13 }
  0x1d   :  { %p3061_p0 = por %p3060_p13, %p3059_p12 }
  0x1f   :  { %p3062_p1 = pnand %p3061_p0, %p3055_p11 }
  0x21   :  { %3065 = shalt.err (!%p3062_p1)
}
  0x22   :  { %32 = dma.hbm_to_vmem [thread:$0]  %s3636_s2, 512, %s3177_s12, [#allocation5], %s3118_s21, %s3118_s21, %s3119_s22  }
  0x23   :  { %s3120_s14 = smov [#allocation8]   ;;  %s3121_s16 = smov [#allocation9]  }
  0x24   :  { %s52_s15 = sshll.u32 %s3120_s14, 4  ;;  %s66_s17 = sshll.u32 %s3121_s16, 4  ;;  %s53_s15 = int_to_ptr.vmem [resolvable:$true] %s52_s15  ;;  %s3214_s17 = int_to_ptr.vmem [resolvable:$true] %s66_s17 }
  0x25   :  { %s3066_s20 = scalar_lea.hbm %s3639_s5, 512 }
  0x26   :  { %p3067_p2 = scmp.ne.s32.totalorder %s3639_s5, %s3066_s20  ;;  %p3070_p3 = scmp.lt.u32.totalorder %s3066_s20, %s3639_s5 }
  0x28   :  { %p3072_p4 = pnand %p3070_p3, %p3067_p2 }
  0x2a   :  { %3075 = shalt.err (!%p3072_p4)
}
  0x2b   :  { %s3076_s2 = scalar_lea.vmem %s53_s15, 512  ;;  %p3081_p6 = scmp.lt.s32.totalorder %s53_s15, %s53_s15 }
  0x2c   :  { %p3077_p5 = scmp.ne.s32.totalorder %s53_s15, %s3076_s2  ;;  %p3082_p7 = scmp.lt.s32.totalorder %s3076_s2, %s3076_s2 }
  0x2e   :  { %p3083_p8 = por %p3082_p7, %p3081_p6 }
  0x30   :  { %p3084_p9 = pnand %p3083_p8, %p3077_p5 }
  0x32   :  { %3087 = shalt.err (!%p3084_p9)
}
  0x33   :  { %58 = dma.hbm_to_vmem [thread:$0]  %s3639_s5, 512, %s53_s15, [#allocation7], %s3118_s21, %s3118_s21, %s3119_s22  }
  0x34   :  { %s3088_s30 = scalar_lea.hbm %s3641_s7, 2048 }
  0x35   :  { %p3089_p10 = scmp.ne.s32.totalorder %s3641_s7, %s3088_s30  ;;  %p3092_p11 = scmp.lt.u32.totalorder %s3088_s30, %s3641_s7 }
  0x37   :  { %p3094_p12 = pnand %p3092_p11, %p3089_p10 }
  0x39   :  { %3097 = shalt.err (!%p3094_p12)
}
  0x3a   :  { %s3098_s14 = scalar_lea.vmem %s3214_s17, 2048  ;;  %p3103_p0 = scmp.lt.s32.totalorder %s3214_s17, %s3214_s17 }
  0x3b   :  { %p3099_p13 = scmp.ne.s32.totalorder %s3214_s17, %s3098_s14  ;;  %p3104_p1 = scmp.lt.s32.totalorder %s3098_s14, %s3098_s14 }
  0x3d   :  { %p3105_p2 = por %p3104_p1, %p3103_p0 }
  0x3f   :  { %p3106_p3 = pnand %p3105_p2, %p3099_p13 }
  0x41   :  { %3109 = shalt.err (!%p3106_p3)
}
  0x42   :  { %72 = dma.hbm_to_vmem [thread:$0]  %s3641_s7, 2048, %s3214_s17, [#allocation10], %s3118_s21, %s3118_s21, %s3119_s22  }
  0x43   :  { %3110 = dma.done.wait [#allocation5], 512  }
  0x44   :  { %3111 = vsyncadd [#allocation5], 4294966784 }
  0x45   :  { %3112 = dma.done.wait [#allocation7], 1536  }
  0x46   :  { %3113 = vsyncadd [#allocation7], 4294965760 }
  0x47   :  { %3114 = dma.done.wait [#allocation10], 2048  }
  0x48   :  { %3115 = vsyncadd [#allocation10], 4294965248  ;;  %v3122_v0 = vmov 0.0|0.0   ;;  %vm3123_vm0 = vmmov 0   ;;  %v3124_v1 = vmov 0.0   ;;  %v100_v2 = vld [vmem:[%s3635_s1] sm:$0xff]  ;;  %v87_v43 = vlaneseq }
  0x49   :  { %2749 = vmatprep.subr.bf16.mxu1 %v3122_v0  ;;  %2483 = vmatprep.mubr.msk.f32.mxu1 %vm3123_vm0, %v3124_v1  ;;  %v101_v3 = vld [vmem:[%s3635_s1 + $0x8] sm:$0xff]  ;;  %v102_v4 = vld [vmem:[%s3635_s1 + $0x10] sm:$0xff]  ;;  %v103_v6 = vld [vmem:[%s3635_s1 + $0x18] sm:$0xff]  ;;  %s3126_s12 = smov 32   ;;  %vm241_vm4 = vcmask 261120  }
  0x4a   :  { %v2717_v5 = vpack.c.bf16 %v101_v3, %v100_v2  ;;  %v2721_v7 = vpack.c.bf16 %v103_v6, %v102_v4  ;;  %v104_v8 = vld [vmem:[%s3635_s1 + $0x20] sm:$0xff]  ;;  %v105_v9 = vld [vmem:[%s3635_s1 + $0x28] sm:$0xff]  ;;  %v106_v12 = vld [vmem:[%s3635_s1 + $0x30] sm:$0xff]  ;;  %v88_v45 = vand.u32 127, %v87_v43 }
  0x4b   :  { %v236_v10 = vld [vmem:[#allocation6] sm:$0xff]  ;;  %v2725_v11 = vpack.c.bf16 %v105_v9, %v104_v8  ;;  %v107_v13 = vld [vmem:[%s3635_s1 + $0x38] sm:$0xff]  ;;  %v237_v14 = vld [vmem:[#allocation6 + $0x8] sm:$0xff] }
  0x4c   :  { %2718 = vmatprep.subr.bf16.mxu0 %v2717_v5  ;;  %v3278_v15 = vpack.c.bf16 %v237_v14, %v236_v10  ;;  %v92_v16 = vld [vmem:[%s3634_s0] sm:$0xff]  ;;  %v238_v17 = vld [vmem:[#allocation6 + $0x10] sm:$0xff]  ;;  %v239_v18 = vld [vmem:[#allocation6 + $0x18] sm:$0xff]  ;;  %v2729_v20 = vpack.c.bf16 %v107_v13, %v106_v12  ;;  %vm89_vm1 = vcmp.ge.s32.totalorder %v88_v45, 64  ;;  %vm90_vm2 = vcmp.lt.s32.totalorder %v88_v45, 96 }
  0x4d   :  { %2720 = vmatpush3.bf16.msra.mxu0 %v2717_v5  ;;  %2463 = vmatprep.mubr.f32.mxu0 %v92_v16  ;;  %v3284_v19 = vpack.c.bf16 %v239_v18, %v238_v17  ;;  %v108_v21 = vld [vmem:[%s3635_s1 + $0x40] sm:$0xff]  ;;  %v109_v22 = vld [vmem:[%s3635_s1 + $0x48] sm:$0xff]  ;;  %v110_v24 = vld [vmem:[%s3635_s1 + $0x50] sm:$0xff] }
  0x4e   :  { %2722 = vmatprep.subr.bf16.mxu0 %v2721_v7  ;;  %2751 = vmatpush3.bf16.msra.mxu1 %v3278_v15  ;;  %v2733_v23 = vpack.c.bf16 %v109_v22, %v108_v21  ;;  %v111_v25 = vld [vmem:[%s3635_s1 + $0x58] sm:$0xff]  ;;  %v112_v27 = vld [vmem:[%s3635_s1 + $0x60] sm:$0xff]  ;;  %v113_v28 = vld [vmem:[%s3635_s1 + $0x68] sm:$0xff] }
  0x4f   :  { %2752 = vmatprep.subr.bf16.mxu1 %v3122_v0  ;;  %v2737_v26 = vpack.c.bf16 %v111_v25, %v110_v24  ;;  %v2741_v29 = vpack.c.bf16 %v113_v28, %v112_v27  ;;  %v114_v30 = vld [vmem:[%s3635_s1 + $0x70] sm:$0xff]  ;;  %v115_v31 = vld [vmem:[%s3635_s1 + $0x78] sm:$0xff]  ;;  %v93_v33 = vld [vmem:[%s3634_s0 + $0x8] sm:$0xff]  ;;  %s3125_s1 = smov 64  }
  0x50   :  { %v2745_v32 = vpack.c.bf16 %v115_v31, %v114_v30  ;;  %v3327_v36 = vld [vmem:[%s3638_s4] ss:$0 sm:$0xff]  ;;  %vm3330_vm3 = vmand %vm89_vm1, %vm90_vm2  ;;  %v94_v12 = vld [vmem:[%s3634_s0 + $0x10] sm:$0xff] }
  0x51   :  { %2724 = vmatpush3.bf16.msra.mxu0 %v2721_v7  ;;  %v95_v13 = vld [vmem:[%s3634_s0 + $0x18] sm:$0xff] }
  0x52   :  { %2726 = vmatprep.subr.bf16.mxu0 %v2725_v11  ;;  %2754 = vmatpush3.bf16.msra.mxu1 %v3284_v19 }
  0x53   :  { %2755 = vmatprep.subr.bf16.mxu1 %v3122_v0 }
  0x55   :  { %2728 = vmatpush3.bf16.msra.mxu0 %v2725_v11  ;;  %2484 = vmatmul.mubr.f32.vlgmr.msra.gmra.mrb[0].mxu1 %v3124_v1 }
  0x56   :  { %2730 = vmatprep.subr.bf16.mxu0 %v2729_v20  ;;  %2757 = vmatpush3.bf16.msra.mxu1 %v3278_v15 }
  0x57   :  { %2758 = vmatprep.subr.bf16.mxu1 %v3122_v0  ;;  %2494 = vmatprep.mubr.msk.f32.mxu1 %vm3123_vm0, %v3124_v1 }
  0x59   :  { %2732 = vmatpush3.bf16.msra.mxu0 %v2729_v20 }
  0x5a   :  { %2734 = vmatprep.subr.bf16.mxu0 %v2733_v23  ;;  %2760 = vmatpush3.bf16.msra.mxu1 %v3284_v19 }
  0x5b   :  { %2761 = vmatprep.subr.bf16.mxu1 %v3122_v0 }
  0x5d   :  { %2736 = vmatpush3.bf16.msra.mxu0 %v2733_v23 }
  0x5e   :  { %2738 = vmatprep.subr.bf16.mxu0 %v2737_v26 }
  0x61   :  { %2740 = vmatpush3.bf16.msra.mxu0 %v2737_v26 }
  0x62   :  { %2742 = vmatprep.subr.bf16.mxu0 %v2741_v29 }
  0x65   :  { %2744 = vmatpush3.bf16.msra.mxu0 %v2741_v29 }
  0x66   :  { %2746 = vmatprep.subr.bf16.mxu0 %v2745_v32 }
  0x69   :  { %2748 = vmatpush3.bf16.msra.mxu0 %v2745_v32 }
  0x6a   :  { %2805 = vmatprep.subr.bf16.mxu0 %v3122_v0 }
  0x6c   :  { %2464 = vmatmul.mubr.f32.vlgmr.msra.gmra.mrb[0].mxu0 %v93_v33 }
  0x6d   :  { %2466 = vmatprep.mubr.f32.mxu0 %v94_v12 }
  0x70   :  { %2467 = vmatmul.mubr.f32.gmra.mrb[2].mxu0 %v95_v13 }
 0x128   :  { %v311_v34 = vpop.f32.mrb[0].mxu1 }
 0x129   :  { %v2485_v35 = vpop.f32.mrb[1].mxu1 }
 0x13f   :  { %v2465_v37 = vpop.f32.mrb[0].mxu0 }
 0x140   :  { %v189_v38 = vpop.f32.mrb[1].mxu0  ;;  %v195_v59 = vadd.f32 %v2465_v37, %v3327_v36 }
 0x141   :  { %v190_v39 = vadd.f32 %v3327_v36, %v189_v38 }
 0x143   :  { %v315_v40 = vadd.f32 %v311_v34, %v190_v39  ;;  %v2468_v18 = vpop.f32.mrb[2].mxu0 }
 0x144   :  { %v199_v20 = vpop.f32.mrb[3].mxu0 }
 0x145   :  { %v2250_v41 = vmul.f32 -1.442695, %v315_v40  ;;  %v200_v22 = vadd.f32 %v3327_v36, %v199_v20 }
 0x147   :  { %2894 = vpow2.f32 %v2250_v41 }
 0x148   :  { %2896 = vtanh.f32 %v315_v40 }
 0x151   :  { %v2895_v42 = vpop.eup %2894 }
 0x152   :  { %v319_v44 = vadd.f32 1.0, %v2895_v42  ;;  %v2897_v47 = vpop.eup %2896  ;;  %v205_v42 = vadd.f32 %v2468_v18, %v3327_v36 }
 0x154   :  { %2898 = vrcp.f32 %v319_v44 }
 0x15e   :  { %v2899_v48 = vpop.eup %2898 }
 0x15f   :  { %v323_v49 = vsel %vm3330_vm3, %v2897_v47, %v2899_v48 }
 0x160   :  { %326 = vrot.lane.b32.xlu0 %v323_v49, %s3125_s1  ;;  %v324_v52 = vmul.f32 0.0, %v323_v49 }
 0x1d2   :  { %v327_v50 = vpop.permute.xlu0 %326 }
 0x1d3   :  { %v329_v51 = vmul.f32 %v327_v50, %v323_v49 }
 0x1d5   :  { %331 = vrot.lane.b32.xlu0 %v329_v51, %s3126_s12 }
 0x247   :  { %v332_v53 = vpop.permute.xlu0 %331 }
 0x248   :  { %v334_v54 = vadd.f32 %v332_v53, %v324_v52 }
 0x24a   :  { %2900 = vtanh.f32 %v334_v54 }
 0x254   :  { %v2901_v55 = vpop.eup %2900 }
 0x255   :  { %337 = vrot.lane.b32.xlu1 %v2901_v55, %s3125_s1 }
 0x2c7   :  { %v338_v56 = vpop.permute.xlu1 %337 }
 0x2c8   :  { %v340_v57 = vmul.f32 %v338_v56, %v323_v49 }
 0x2ca   :  { %342 = vrot.lane.b32.xlu1 %v340_v57, %s3126_s12 }
 0x33c   :  { %v343_v58 = vpop.permute.xlu1 %342 }
 0x33d   :  { %345 = vst.msk [vmem:[#allocation2] sm:$0xff] %vm241_vm4, %v343_v58  ;;  %2495 = vmatmul.mubr.msk.f32.vlgmr.msra.gmra.mrb[2].mxu1 %vm241_vm4, %v343_v58  ;;  %v96_v58 = vld [vmem:[%s3634_s0 + $0x20] sm:$0xff] }
 0x33e   :  { %2763 = vmatpush3.bf16.msra.mxu1 %v3278_v15  ;;  %2505 = vmatprep.mubr.msk.f32.mxu1 %vm3123_vm0, %v3124_v1 }
 0x33f   :  { %2764 = vmatprep.subr.bf16.mxu1 %v3122_v0  ;;  %2469 = vmatprep.mubr.f32.mxu0 %v96_v58 }
 0x342   :  { %2766 = vmatpush3.bf16.msra.mxu1 %v3284_v19 }
 0x343   :  { %2767 = vmatprep.subr.bf16.mxu1 %v3122_v0 }
 0x410   :  { %v416_v60 = vpop.f32.mrb[2].mxu1 }
 0x411   :  { %v420_v61 = vadd.f32 %v416_v60, %v195_v59  ;;  %v2496_v62 = vpop.f32.mrb[3].mxu1  ;;  %v97_v59 = vld [vmem:[%s3634_s0 + $0x28] sm:$0xff] }
 0x412   :  { %2470 = vmatmul.mubr.f32.gmra.mrb[4].mxu0 %v97_v59 }
 0x413   :  { %v2252_v63 = vmul.f32 -1.442695, %v420_v61 }
 0x415   :  { %2902 = vpow2.f32 %v2252_v63 }
 0x416   :  { %2904 = vtanh.f32 %v420_v61 }
 0x41f   :  { %v2903_v2 = vpop.eup %2902 }
 0x420   :  { %v424_v3 = vadd.f32 1.0, %v2903_v2  ;;  %v2905_v4 = vpop.eup %2904 }
 0x422   :  { %2906 = vrcp.f32 %v424_v3 }
 0x42c   :  { %v2907_v5 = vpop.eup %2906 }
 0x42d   :  { %v428_v6 = vsel %vm3330_vm3, %v2905_v4, %v2907_v5 }
 0x42e   :  { %431 = vrot.lane.b32.xlu0 %v428_v6, %s3125_s1  ;;  %v429_v9 = vmul.f32 %v428_v6, %v334_v54 }
 0x4a0   :  { %v432_v7 = vpop.permute.xlu0 %431 }
 0x4a1   :  { %v434_v8 = vmul.f32 %v432_v7, %v428_v6 }
 0x4a3   :  { %436 = vrot.lane.b32.xlu1 %v434_v8, %s3126_s12 }
 0x4e5   :  { %v2471_v63 = vpop.f32.mrb[4].mxu0 }
 0x4e6   :  { %v209_v2 = vpop.f32.mrb[5].mxu0 }
 0x4e7   :  { %v210_v4 = vadd.f32 %v3327_v36, %v209_v2  ;;  %v1247_v2 = vld [vmem:[#allocation6 + $0x28] sm:$0xff] }
 0x515   :  { %v437_v10 = vpop.permute.xlu1 %436 }
 0x516   :  { %v439_v11 = vadd.f32 %v437_v10, %v429_v9 }
 0x518   :  { %2908 = vtanh.f32 %v439_v11 }
 0x522   :  { %v2909_v14 = vpop.eup %2908 }
 0x523   :  { %442 = vrot.lane.b32.xlu0 %v2909_v14, %s3125_s1 }
 0x595   :  { %v443_v16 = vpop.permute.xlu0 %442 }
 0x596   :  { %v445_v17 = vmul.f32 %v443_v16, %v428_v6 }
 0x598   :  { %447 = vrot.lane.b32.xlu1 %v445_v17, %s3126_s12 }
 0x60a   :  { %v448_v21 = vpop.permute.xlu1 %447 }
 0x60b   :  { %451 = vst.msk [vmem:[#allocation2 + $0x8] sm:$0xff] %vm241_vm4, %v448_v21  ;;  %2506 = vmatmul.mubr.msk.f32.vlgmr.msra.gmra.mrb[4].mxu1 %vm241_vm4, %v448_v21 }
 0x60c   :  { %2769 = vmatpush3.bf16.msra.mxu1 %v3278_v15  ;;  %2516 = vmatprep.mubr.msk.f32.mxu1 %vm3123_vm0, %v3124_v1 }
 0x60d   :  { %2770 = vmatprep.subr.bf16.mxu1 %v3122_v0 }
 0x610   :  { %2772 = vmatpush3.bf16.msra.mxu1 %v3284_v19 }
 0x611   :  { %2773 = vmatprep.subr.bf16.mxu1 %v3122_v0 }
 0x6de   :  { %v522_v23 = vpop.f32.mrb[4].mxu1 }
 0x6df   :  { %v526_v24 = vadd.f32 %v522_v23, %v200_v22  ;;  %v2507_v25 = vpop.f32.mrb[5].mxu1 }
 0x6e0   :  { %v215_v25 = vadd.f32 %v2471_v63, %v3327_v36  ;;  %v1246_v63 = vld [vmem:[#allocation6 + $0x20] sm:$0xff] }
 0x6e1   :  { %v2254_v26 = vmul.f32 -1.442695, %v526_v24 }
 0x6e3   :  { %2910 = vpow2.f32 %v2254_v26 }
 0x6e4   :  { %2912 = vtanh.f32 %v526_v24 }
 0x6ed   :  { %v2911_v27 = vpop.eup %2910 }
 0x6ee   :  { %v530_v28 = vadd.f32 1.0, %v2911_v27  ;;  %v2913_v29 = vpop.eup %2912 }
 0x6f0   :  { %2914 = vrcp.f32 %v530_v28 }
 0x6fa   :  { %v2915_v30 = vpop.eup %2914 }
 0x6fb   :  { %v534_v31 = vsel %vm3330_vm3, %v2913_v29, %v2915_v30 }
 0x6fc   :  { %537 = vrot.lane.b32.xlu0 %v534_v31, %s3125_s1  ;;  %v535_v34 = vmul.f32 %v534_v31, %v439_v11 }
 0x76e   :  { %v538_v32 = vpop.permute.xlu0 %537 }
 0x76f   :  { %v540_v33 = vmul.f32 %v538_v32, %v534_v31 }
 0x771   :  { %542 = vrot.lane.b32.xlu1 %v540_v33, %s3126_s12 }
 0x7e3   :  { %v543_v35 = vpop.permute.xlu1 %542 }
 0x7e4   :  { %v545_v37 = vadd.f32 %v543_v35, %v535_v34 }
 0x7e6   :  { %2916 = vtanh.f32 %v545_v37 }
 0x7f0   :  { %v2917_v38 = vpop.eup %2916 }
 0x7f1   :  { %548 = vrot.lane.b32.xlu0 %v2917_v38, %s3125_s1 }
 0x863   :  { %v549_v39 = vpop.permute.xlu0 %548 }
 0x864   :  { %v551_v40 = vmul.f32 %v549_v39, %v534_v31 }
 0x866   :  { %553 = vrot.lane.b32.xlu1 %v551_v40, %s3126_s12 }
 0x8d8   :  { %v554_v41 = vpop.permute.xlu1 %553 }
 0x8d9   :  { %557 = vst.msk [vmem:[#allocation2 + $0x10] sm:$0xff] %vm241_vm4, %v554_v41  ;;  %2517 = vmatmul.mubr.msk.f32.vlgmr.msra.gmra.mrb[6].mxu1 %vm241_vm4, %v554_v41  ;;  %v98_v41 = vld [vmem:[%s3634_s0 + $0x30] sm:$0xff] }
 0x8da   :  { %2775 = vmatpush3.bf16.msra.mxu1 %v3278_v15  ;;  %2527 = vmatprep.mubr.msk.f32.mxu1 %vm3123_vm0, %v3124_v1 }
 0x8db   :  { %2776 = vmatprep.subr.bf16.mxu1 %v3122_v0  ;;  %2472 = vmatprep.mubr.f32.mxu0 %v98_v41 }
 0x8de   :  { %2778 = vmatpush3.bf16.msra.mxu1 %v3284_v19 }
 0x8df   :  { %2779 = vmatprep.subr.bf16.mxu1 %v3122_v0 }
 0x9ac   :  { %v628_v43 = vpop.f32.mrb[6].mxu1 }
 0x9ad   :  { %v632_v44 = vadd.f32 %v628_v43, %v205_v42  ;;  %v2518_v45 = vpop.f32.mrb[7].mxu1  ;;  %v99_v42 = vld [vmem:[%s3634_s0 + $0x38] sm:$0xff] }
 0x9ae   :  { %2473 = vmatmul.mubr.f32.gmra.mrb[6].mxu0 %v99_v42 }
 0x9af   :  { %v2256_v47 = vmul.f32 -1.442695, %v632_v44  ;;  %2591 = vmatprep.mubr.msk.f32.mxu0 %vm3123_vm0, %v3124_v1 }
 0x9b1   :  { %2918 = vpow2.f32 %v2256_v47 }
 0x9b2   :  { %2920 = vtanh.f32 %v632_v44 }
 0x9bb   :  { %v2919_v48 = vpop.eup %2918 }
 0x9bc   :  { %v636_v49 = vadd.f32 1.0, %v2919_v48  ;;  %v2921_v50 = vpop.eup %2920 }
 0x9be   :  { %2922 = vrcp.f32 %v636_v49 }
 0x9c8   :  { %v2923_v51 = vpop.eup %2922 }
 0x9c9   :  { %v640_v52 = vsel %vm3330_vm3, %v2921_v50, %v2923_v51 }
 0x9ca   :  { %643 = vrot.lane.b32.xlu0 %v640_v52, %s3125_s1  ;;  %v641_v55 = vmul.f32 %v640_v52, %v545_v37 }
 0xa3c   :  { %v644_v53 = vpop.permute.xlu0 %643 }
 0xa3d   :  { %v646_v54 = vmul.f32 %v644_v53, %v640_v52 }
 0xa3f   :  { %648 = vrot.lane.b32.xlu1 %v646_v54, %s3126_s12 }
 0xa81   :  { %v3435_v47 = vpop.f32.mrb[6].mxu0 }
 0xa82   :  { %v219_v48 = vpop.f32.mrb[7].mxu0 }
 0xa83   :  { %v220_v50 = vadd.f32 %v3327_v36, %v219_v48 }
 0xab1   :  { %v649_v56 = vpop.permute.xlu1 %648 }
 0xab2   :  { %v651_v57 = vadd.f32 %v649_v56, %v641_v55 }
 0xab4   :  { %2924 = vtanh.f32 %v651_v57 }
 0xabe   :  { %v2925_v60 = vpop.eup %2924 }
 0xabf   :  { %654 = vrot.lane.b32.xlu0 %v2925_v60, %s3125_s1 }
 0xb31   :  { %v655_v61 = vpop.permute.xlu0 %654 }
 0xb32   :  { %v657_v62 = vmul.f32 %v655_v61, %v640_v52 }
 0xb34   :  { %659 = vrot.lane.b32.xlu1 %v657_v62, %s3126_s12 }
 0xba6   :  { %v660_v3 = vpop.permute.xlu1 %659 }
 0xba7   :  { %663 = vst.msk [vmem:[#allocation2 + $0x18] sm:$0xff] %vm241_vm4, %v660_v3  ;;  %2528 = vmatmul.mubr.msk.f32.vlgmr.msra.gmra.mrb[8].mxu1 %vm241_vm4, %v660_v3  ;;  %v1096_v3 = vld [vmem:[#allocation4] sm:$0xff] }
 0xba8   :  { %2781 = vmatpush3.bf16.msra.mxu1 %v3278_v15  ;;  %2538 = vmatprep.mubr.msk.f32.mxu1 %vm3123_vm0, %v3124_v1 }
 0xba9   :  { %2782 = vmatprep.subr.bf16.mxu1 %v3122_v0 }
 0xbac   :  { %2784 = vmatpush3.bf16.msra.mxu1 %v3284_v19 }
 0xbad   :  { %2785 = vmatprep.subr.bf16.mxu1 %v3122_v0 }
 0xc7a   :  { %v734_v5 = vpop.f32.mrb[8].mxu1 }
 0xc7b   :  { %v738_v6 = vadd.f32 %v734_v5, %v210_v4  ;;  %v2529_v7 = vpop.f32.mrb[9].mxu1  ;;  %v3452_v4 = vpack.c.bf16 %v1247_v2, %v1246_v63  ;;  %v1097_v5 = vld [vmem:[#allocation4 + $0x8] sm:$0xff] }
 0xc7d   :  { %v2258_v8 = vmul.f32 -1.442695, %v738_v6  ;;  %2807 = vmatpush3.bf16.msra.mxu0 %v3452_v4 }
 0xc7e   :  { %2808 = vmatprep.subr.bf16.mxu0 %v3122_v0 }
 0xc7f   :  { %2926 = vpow2.f32 %v2258_v8  ;;  %v1248_v8 = vld [vmem:[#allocation6 + $0x30] sm:$0xff] }
 0xc80   :  { %2928 = vtanh.f32 %v738_v6  ;;  %v2797_v6 = vpack.c.bf16 %v1097_v5, %v1096_v3 }
 0xc89   :  { %v2927_v9 = vpop.eup %2926 }
 0xc8a   :  { %v742_v10 = vadd.f32 1.0, %v2927_v9  ;;  %v2929_v11 = vpop.eup %2928  ;;  %v1249_v9 = vld [vmem:[#allocation6 + $0x38] sm:$0xff] }
 0xc8c   :  { %2930 = vrcp.f32 %v742_v10  ;;  %v3457_v10 = vpack.c.bf16 %v1249_v9, %v1248_v8 }
 0xc8e   :  { %2810 = vmatpush3.bf16.msra.mxu0 %v3457_v10 }
 0xc8f   :  { %2811 = vmatprep.subr.bf16.mxu0 %v3122_v0 }
 0xc91   :  { %2592 = vmatmul.mubr.f32.vlgmr.msra.gmra.mrb[8].mxu0 %v3124_v1 }
 0xc92   :  { %2813 = vmatpush3.bf16.msra.mxu0 %v3452_v4  ;;  %2602 = vmatprep.mubr.msk.f32.mxu0 %vm3123_vm0, %v3124_v1 }
 0xc93   :  { %2814 = vmatprep.subr.bf16.mxu0 %v3122_v0 }
 0xc96   :  { %v2931_v12 = vpop.eup %2930  ;;  %2816 = vmatpush3.bf16.msra.mxu0 %v3457_v10 }
 0xc97   :  { %v746_v13 = vsel %vm3330_vm3, %v2929_v11, %v2931_v12  ;;  %2823 = vmatprep.subr.bf16.mxu0 %v3122_v0 }
 0xc98   :  { %749 = vrot.lane.b32.xlu0 %v746_v13, %s3125_s1  ;;  %v747_v17 = vmul.f32 %v746_v13, %v651_v57 }
 0xd0a   :  { %v750_v14 = vpop.permute.xlu0 %749 }
 0xd0b   :  { %v752_v16 = vmul.f32 %v750_v14, %v746_v13  ;;  %v1099_v14 = vld [vmem:[#allocation4 + $0x18] sm:$0xff] }
 0xd0d   :  { %754 = vrot.lane.b32.xlu1 %v752_v16, %s3126_s12 }
 0xd7f   :  { %v755_v18 = vpop.permute.xlu1 %754 }
 0xd80   :  { %v757_v20 = vadd.f32 %v755_v18, %v747_v17  ;;  %v1088_v18 = vld [vmem:[#allocation2] sm:$0xff] }
 0xd82   :  { %2932 = vtanh.f32 %v757_v20 }
 0xd8c   :  { %v2933_v21 = vpop.eup %2932 }
 0xd8d   :  { %760 = vrot.lane.b32.xlu0 %v2933_v21, %s3125_s1  ;;  %v1090_v21 = vld [vmem:[#allocation2 + $0x10] sm:$0xff] }
 0xdff   :  { %v761_v22 = vpop.permute.xlu0 %760 }
 0xe00   :  { %v763_v23 = vmul.f32 %v761_v22, %v746_v13  ;;  %v1098_v13 = vld [vmem:[#allocation4 + $0x10] sm:$0xff]  ;;  %v1091_v22 = vld [vmem:[#allocation2 + $0x18] sm:$0xff] }
 0xe01   :  { %v2801_v16 = vpack.c.bf16 %v1099_v14, %v1098_v13 }
 0xe02   :  { %765 = vrot.lane.b32.xlu1 %v763_v23, %s3126_s12 }
 0xe74   :  { %v766_v24 = vpop.permute.xlu1 %765 }
 0xe75   :  { %769 = vst.msk [vmem:[#allocation2 + $0x20] sm:$0xff] %vm241_vm4, %v766_v24  ;;  %2539 = vmatmul.mubr.msk.f32.vlgmr.msra.gmra.mrb[10].mxu1 %vm241_vm4, %v766_v24 }
 0xe76   :  { %2787 = vmatpush3.bf16.msra.mxu1 %v3278_v15  ;;  %2549 = vmatprep.mubr.msk.f32.mxu1 %vm3123_vm0, %v3124_v1 }
 0xe77   :  { %2788 = vmatprep.subr.bf16.mxu1 %v3122_v0 }
 0xe7a   :  { %2790 = vmatpush3.bf16.msra.mxu1 %v3284_v19 }
 0xe7b   :  { %2791 = vmatprep.subr.bf16.mxu1 %v3122_v0 }
 0xe7c   :  { %v1092_v23 = vld [vmem:[#allocation2 + $0x20] sm:$0xff] }
 0xf48   :  { %v840_v26 = vpop.f32.mrb[10].mxu1 }
 0xf49   :  { %v844_v27 = vadd.f32 %v840_v26, %v215_v25  ;;  %v2540_v28 = vpop.f32.mrb[11].mxu1  ;;  %v1317_v26 = vpop.f32.mrb[8].mxu0 }
 0xf4a   :  { %v225_v28 = vadd.f32 %v3435_v47, %v3327_v36 }
 0xf4b   :  { %v2260_v29 = vmul.f32 -1.442695, %v844_v27 }
 0xf4d   :  { %2934 = vpow2.f32 %v2260_v29 }
 0xf4e   :  { %2936 = vtanh.f32 %v844_v27  ;;  %v2593_v27 = vpop.f32.mrb[9].mxu0 }
 0xf57   :  { %v2935_v30 = vpop.eup %2934 }
 0xf58   :  { %v848_v31 = vadd.f32 1.0, %v2935_v30  ;;  %v2937_v32 = vpop.eup %2936 }
 0xf5a   :  { %2938 = vrcp.f32 %v848_v31 }
 0xf64   :  { %v2939_v33 = vpop.eup %2938 }
 0xf65   :  { %v852_v34 = vsel %vm3330_vm3, %v2937_v32, %v2939_v33  ;;  %v3488_v32 = vld [vmem:[%s3638_s4 + $0x1] ss:$0 sm:$0xff] }
 0xf66   :  { %855 = vrot.lane.b32.xlu0 %v852_v34, %s3125_s1  ;;  %v853_v38 = vmul.f32 %v852_v34, %v757_v20  ;;  %v1089_v20 = vld [vmem:[#allocation2 + $0x8] sm:$0xff] }
 0xfd8   :  { %v856_v35 = vpop.permute.xlu0 %855 }
 0xfd9   :  { %v858_v37 = vmul.f32 %v856_v35, %v852_v34 }
 0xfdb   :  { %860 = vrot.lane.b32.xlu1 %v858_v37, %s3126_s12 }
0x104d   :  { %v861_v39 = vpop.permute.xlu1 %860 }
0x104e   :  { %v863_v40 = vadd.f32 %v861_v39, %v853_v38 }
0x1050   :  { %2940 = vtanh.f32 %v863_v40 }
0x105a   :  { %v2941_v43 = vpop.eup %2940 }
0x105b   :  { %866 = vrot.lane.b32.xlu0 %v2941_v43, %s3125_s1 }
0x10cd   :  { %v867_v44 = vpop.permute.xlu0 %866 }
0x10ce   :  { %v869_v45 = vmul.f32 %v867_v44, %v852_v34 }
0x10d0   :  { %871 = vrot.lane.b32.xlu1 %v869_v45, %s3126_s12 }
0x1142   :  { %v872_v49 = vpop.permute.xlu1 %871 }
0x1143   :  { %875 = vst.msk [vmem:[#allocation2 + $0x28] sm:$0xff] %vm241_vm4, %v872_v49  ;;  %2550 = vmatmul.mubr.msk.f32.vlgmr.msra.gmra.mrb[12].mxu1 %vm241_vm4, %v872_v49 }
0x1144   :  { %2793 = vmatpush3.bf16.msra.mxu1 %v3278_v15  ;;  %2560 = vmatprep.mubr.msk.f32.mxu1 %vm3123_vm0, %v3124_v1 }
0x1145   :  { %2794 = vmatprep.subr.bf16.mxu1 %v3122_v0 }
0x1148   :  { %2796 = vmatpush3.bf16.msra.mxu1 %v3284_v19 }
0x1149   :  { %2798 = vmatprep.subr.bf16.mxu1 %v2797_v6 }
0x114a   :  { %v1093_v24 = vld [vmem:[#allocation2 + $0x28] sm:$0xff] }
0x1216   :  { %v946_v51 = vpop.f32.mrb[12].mxu1 }
0x1217   :  { %v950_v52 = vadd.f32 %v946_v51, %v220_v50  ;;  %v2551_v53 = vpop.f32.mrb[13].mxu1 }
0x1219   :  { %v2262_v54 = vmul.f32 -1.442695, %v950_v52 }
0x121b   :  { %2942 = vpow2.f32 %v2262_v54 }
0x121c   :  { %2944 = vtanh.f32 %v950_v52 }
0x1225   :  { %v2943_v55 = vpop.eup %2942 }
0x1226   :  { %v954_v56 = vadd.f32 1.0, %v2943_v55  ;;  %v2945_v57 = vpop.eup %2944 }
0x1228   :  { %2946 = vrcp.f32 %v954_v56 }
0x1232   :  { %v2947_v15 = vpop.eup %2946 }
0x1233   :  { %v958_v58 = vsel %vm3330_vm3, %v2945_v57, %v2947_v15 }
0x1234   :  { %961 = vrot.lane.b32.xlu0 %v958_v58, %s3125_s1  ;;  %v959_v60 = vmul.f32 %v958_v58, %v863_v40 }
0x12a6   :  { %v962_v59 = vpop.permute.xlu0 %961 }
0x12a7   :  { %v964_v19 = vmul.f32 %v962_v59, %v958_v58 }
0x12a9   :  { %966 = vrot.lane.b32.xlu1 %v964_v19, %s3126_s12 }
0x131b   :  { %v967_v61 = vpop.permute.xlu1 %966 }
0x131c   :  { %v3449_v62 = vadd.f32 %v967_v61, %v959_v60 }
0x131e   :  { %2948 = vtanh.f32 %v3449_v62 }
0x1328   :  { %v2949_v7 = vpop.eup %2948 }
0x1329   :  { %972 = vrot.lane.b32.xlu0 %v2949_v7, %s3125_s1 }
0x139b   :  { %v973_v11 = vpop.permute.xlu0 %972 }
0x139c   :  { %v975_v12 = vmul.f32 %v973_v11, %v958_v58 }
0x139e   :  { %977 = vrot.lane.b32.xlu1 %v975_v12, %s3126_s12 }
0x1410   :  { %v978_v17 = vpop.permute.xlu1 %977 }
0x1411   :  { %981 = vst.msk [vmem:[#allocation2 + $0x30] sm:$0xff] %vm241_vm4, %v978_v17  ;;  %2561 = vmatmul.mubr.msk.f32.vlgmr.msra.gmra.mrb[14].mxu1 %vm241_vm4, %v978_v17 }
0x1412   :  { %2800 = vmatpush3.bf16.msra.mxu1 %v2797_v6  ;;  %2571 = vmatprep.mubr.msk.f32.mxu1 %vm241_vm4, %v1088_v18 }
0x1413   :  { %2802 = vmatprep.subr.bf16.mxu1 %v2801_v16 }
0x1416   :  { %2804 = vmatpush3.bf16.msra.mxu1 %v2801_v16 }
0x1417   :  { %2817 = vmatprep.subr.bf16.mxu1 %v3122_v0 }
0x1418   :  { %v1094_v25 = vld [vmem:[#allocation2 + $0x30] sm:$0xff] }
0x1419   :  { %2572 = vmatmul.mubr.msk.f32.vlgmr.msra.gmra.mrb[16].mxu1 %vm241_vm4, %v1089_v20 }
0x141a   :  { %2574 = vmatprep.mubr.msk.f32.mxu1 %vm241_vm4, %v1090_v21  ;;  %2819 = vmatpush3.bf16.msra.mxu1 %v3452_v4 }
0x141b   :  { %2820 = vmatprep.subr.bf16.mxu1 %v3122_v0 }
0x141d   :  { %2575 = vmatmul.mubr.msk.f32.gmra.mrb[18].mxu1 %vm241_vm4, %v1091_v22 }
0x141e   :  { %2577 = vmatprep.mubr.msk.f32.mxu1 %vm241_vm4, %v1092_v23  ;;  %2822 = vmatpush3.bf16.msra.mxu1 %v3457_v10 }
0x141f   :  { %2829 = vmatprep.subr.bf16.mxu1 %v3122_v0 }
0x1421   :  { %2578 = vmatmul.mubr.msk.f32.gmra.mrb[20].mxu1 %vm241_vm4, %v1093_v24 }
0x1422   :  { %2580 = vmatprep.mubr.msk.f32.mxu1 %vm241_vm4, %v1094_v25 }
0x14e4   :  { %v1052_v29 = vpop.f32.mrb[14].mxu1 }
0x14e5   :  { %v1056_v30 = vadd.f32 %v1052_v29, %v225_v28  ;;  %v2562_v31 = vpop.f32.mrb[15].mxu1 }
0x14e7   :  { %v2264_v50 = vmul.f32 -1.442695, %v1056_v30 }
0x14ec   :  { %v2573_v33 = vpop.f32.mrb[16].mxu1 }
0x14ed   :  { %v1198_v34 = vpop.f32.mrb[17].mxu1  ;;  %v1204_v9 = vadd.f32 %v2573_v33, %v3488_v32 }
0x14ee   :  { %v1199_v35 = vadd.f32 %v3488_v32, %v1198_v34 }
0x14f0   :  { %v1321_v37 = vadd.f32 %v1317_v26, %v1199_v35  ;;  %v3491_v38 = vpop.f32.mrb[18].mxu1 }
0x14f1   :  { %v3493_v39 = vpop.f32.mrb[19].mxu1 }
0x14f2   :  { %v2275_v40 = vmul.f32 -1.442695, %v1321_v37  ;;  %v1209_v35 = vadd.f32 %v3488_v32, %v3493_v39 }
0x14f4   :  { %2950 = vpow2.f32 %v2275_v40  ;;  %v3495_v36 = vpop.f32.mrb[20].mxu1 }
0x14f5   :  { %v3497_v41 = vpop.f32.mrb[21].mxu1  ;;  %2952 = vtanh.f32 %v1321_v37 }
0x14fe   :  { %v2951_v42 = vpop.eup %2950 }
0x14ff   :  { %v1325_v43 = vadd.f32 1.0, %v2951_v42  ;;  %v2953_v44 = vpop.eup %2952 }
0x1501   :  { %2954 = vrcp.f32 %v1325_v43 }
0x1502   :  { %2956 = vpow2.f32 %v2264_v50 }
0x150b   :  { %v2955_v45 = vpop.eup %2954 }
0x150c   :  { %v1329_v47 = vsel %vm3330_vm3, %v2953_v44, %v2955_v45  ;;  %v2957_v51 = vpop.eup %2956 }
0x150d   :  { %1332 = vrot.lane.b32.xlu0 %v1329_v47, %s3125_s1  ;;  %v1330_v52 = vmul.f32 0.0, %v1329_v47  ;;  %v1060_v53 = vadd.f32 1.0, %v2957_v51 }
0x157f   :  { %v1333_v48 = vpop.permute.xlu0 %1332 }
0x1580   :  { %v1335_v49 = vmul.f32 %v1333_v48, %v1329_v47 }
0x1582   :  { %1337 = vrot.lane.b32.xlu1 %v1335_v49, %s3126_s12 }
0x15f4   :  { %v1338_v54 = vpop.permute.xlu1 %1337 }
0x15f5   :  { %v1340_v55 = vadd.f32 %v1338_v54, %v1330_v52 }
0x15f7   :  { %2958 = vtanh.f32 %v1340_v55 }
0x15f8   :  { %2960 = vrcp.f32 %v1060_v53 }
0x15f9   :  { %2962 = vtanh.f32 %v1056_v30 }
0x1601   :  { %v2959_v56 = vpop.eup %2958 }
0x1602   :  { %v2961_v57 = vpop.eup %2960  ;;  %1343 = vrot.lane.b32.xlu0 %v2959_v56, %s3125_s1 }
0x1603   :  { %v2963_v15 = vpop.eup %2962 }
0x1604   :  { %v1064_v58 = vsel %vm3330_vm3, %v2963_v15, %v2961_v57  ;;  %v1214_v15 = vadd.f32 %v3491_v38, %v3488_v32 }
0x1605   :  { %v1065_v2 = vmul.f32 %v1064_v58, %v3449_v62 }
0x1606   :  { %1067 = vrot.lane.b32.xlu0 %v1064_v58, %s3125_s1 }
0x1674   :  { %v1344_v59 = vpop.permute.xlu0 %1343 }
0x1675   :  { %v1346_v19 = vmul.f32 %v1344_v59, %v1329_v47 }
0x1677   :  { %1349 = vrot.lane.b32.xlu1 %v1346_v19, %s3126_s12 }
0x1678   :  { %v1068_v60 = vpop.permute.xlu0 %1067 }
0x1679   :  { %v1070_v61 = vmul.f32 %v1068_v60, %v1064_v58 }
0x167b   :  { %1072 = vrot.lane.b32.xlu0 %v1070_v61, %s3126_s12 }
0x16e9   :  { %v1350_v63 = vpop.permute.xlu1 %1349 }
0x16ea   :  { %2603 = vmatmul.mubr.msk.f32.vlgmr.msra.gmra.mrb[10].mxu0 %vm241_vm4, %v1350_v63 }
0x16eb   :  { %2825 = vmatpush3.bf16.msra.mxu0 %v3452_v4  ;;  %2624 = vmatprep.mubr.msk.f32.mxu0 %vm3123_vm0, %v3124_v1 }
0x16ec   :  { %2826 = vmatprep.subr.bf16.mxu0 %v3122_v0 }
0x16ed   :  { %v1073_v3 = vpop.permute.xlu0 %1072 }
0x16ee   :  { %v1075_v5 = vadd.f32 %v1073_v3, %v1065_v2 }
0x16ef   :  { %2828 = vmatpush3.bf16.msra.mxu0 %v3457_v10 }
0x16f0   :  { %2964 = vtanh.f32 %v1075_v5  ;;  %2835 = vmatprep.subr.bf16.mxu0 %v3122_v0 }
0x16fa   :  { %v2965_v6 = vpop.eup %2964 }
0x16fb   :  { %1078 = vrot.lane.b32.xlu0 %v2965_v6, %s3125_s1 }
0x176d   :  { %v1079_v7 = vpop.permute.xlu0 %1078 }
0x176e   :  { %v1081_v8 = vmul.f32 %v1079_v7, %v1064_v58 }
0x1770   :  { %1083 = vrot.lane.b32.xlu0 %v1081_v8, %s3126_s12 }
0x17bd   :  { %v1419_v11 = vpop.f32.mrb[10].mxu0 }
0x17be   :  { %v1423_v62 = vadd.f32 %v1419_v11, %v1204_v9  ;;  %v2604_v12 = vpop.f32.mrb[11].mxu0 }
0x17c0   :  { %v2277_v13 = vmul.f32 -1.442695, %v1423_v62 }
0x17c2   :  { %2966 = vpow2.f32 %v2277_v13 }
0x17c3   :  { %2968 = vtanh.f32 %v1423_v62 }
0x17cc   :  { %v2967_v14 = vpop.eup %2966 }
0x17cd   :  { %v1427_v16 = vadd.f32 1.0, %v2967_v14  ;;  %v2969_v17 = vpop.eup %2968  ;;  %v1219_v14 = vadd.f32 %v3488_v32, %v3497_v41 }
0x17cf   :  { %2970 = vrcp.f32 %v1427_v16 }
0x17d9   :  { %v2971_v18 = vpop.eup %2970 }
0x17da   :  { %v1431_v20 = vsel %vm3330_vm3, %v2969_v17, %v2971_v18 }
0x17db   :  { %1434 = vrot.lane.b32.xlu1 %v1431_v20, %s3125_s1  ;;  %v1432_v27 = vmul.f32 %v1431_v20, %v1340_v55 }
0x17e2   :  { %v1084_v21 = vpop.permute.xlu0 %1083 }
0x17e3   :  { %1087 = vst.msk [vmem:[#allocation2 + $0x38] sm:$0xff] %vm241_vm4, %v1084_v21 }
0x17ea   :  { %v1095_v22 = vld [vmem:[#allocation2 + $0x38] sm:$0xff] }
0x17eb   :  { %2581 = vmatmul.mubr.msk.f32.gmra.mrb[22].mxu1 %vm241_vm4, %v1095_v22 }
0x17ec   :  { %2613 = vmatprep.mubr.msk.f32.mxu1 %vm3123_vm0, %v3124_v1 }
0x184d   :  { %v1435_v23 = vpop.permute.xlu1 %1434 }
0x184e   :  { %v1437_v24 = vmul.f32 %v1435_v23, %v1431_v20 }
0x1850   :  { %1439 = vrot.lane.b32.xlu1 %v1437_v24, %s3126_s12 }
0x18be   :  { %v3528_v25 = vpop.f32.mrb[22].mxu1 }
0x18bf   :  { %v3530_v26 = vpop.f32.mrb[23].mxu1 }
0x18c2   :  { %v1440_v28 = vpop.permute.xlu1 %1439 }
0x18c3   :  { %v1442_v29 = vadd.f32 %v1440_v28, %v1432_v27 }
0x18c5   :  { %2972 = vtanh.f32 %v1442_v29 }
0x18cf   :  { %v2973_v30 = vpop.eup %2972 }
0x18d0   :  { %1445 = vrot.lane.b32.xlu1 %v2973_v30, %s3125_s1 }
0x1942   :  { %v1446_v31 = vpop.permute.xlu1 %1445 }
0x1943   :  { %v1448_v33 = vmul.f32 %v1446_v31, %v1431_v20 }
0x1945   :  { %1451 = vrot.lane.b32.xlu1 %v1448_v33, %s3126_s12 }
0x19b7   :  { %v1452_v34 = vpop.permute.xlu1 %1451 }
0x19b8   :  { %2614 = vmatmul.mubr.msk.f32.vlgmr.msra.gmra.mrb[24].mxu1 %vm241_vm4, %v1452_v34 }
0x19b9   :  { %2831 = vmatpush3.bf16.msra.mxu1 %v3452_v4  ;;  %2635 = vmatprep.mubr.msk.f32.mxu1 %vm3123_vm0, %v3124_v1 }
0x19ba   :  { %2832 = vmatprep.subr.bf16.mxu1 %v3122_v0 }
0x19bd   :  { %2834 = vmatpush3.bf16.msra.mxu1 %v3457_v10 }
0x19be   :  { %2841 = vmatprep.subr.bf16.mxu1 %v3122_v0 }
0x1a8b   :  { %v1521_v37 = vpop.f32.mrb[24].mxu1 }
0x1a8c   :  { %v1525_v40 = vadd.f32 %v1521_v37, %v1209_v35  ;;  %v2615_v42 = vpop.f32.mrb[25].mxu1 }
0x1a8e   :  { %v2279_v43 = vmul.f32 -1.442695, %v1525_v40 }
0x1a90   :  { %2974 = vpow2.f32 %v2279_v43 }
0x1a91   :  { %2976 = vtanh.f32 %v1525_v40  ;;  %v1224_v40 = vadd.f32 %v3495_v36, %v3488_v32 }
0x1a9a   :  { %v2975_v44 = vpop.eup %2974 }
0x1a9b   :  { %v1529_v45 = vadd.f32 1.0, %v2975_v44  ;;  %v2977_v47 = vpop.eup %2976 }
0x1a9d   :  { %2978 = vrcp.f32 %v1529_v45 }
0x1aa7   :  { %v2979_v48 = vpop.eup %2978 }
0x1aa8   :  { %v1533_v49 = vsel %vm3330_vm3, %v2977_v47, %v2979_v48 }
0x1aa9   :  { %1536 = vrot.lane.b32.xlu0 %v1533_v49, %s3125_s1  ;;  %v1534_v39 = vmul.f32 %v1533_v49, %v1442_v29 }
0x1b1b   :  { %v1537_v50 = vpop.permute.xlu0 %1536 }
0x1b1c   :  { %v1539_v51 = vmul.f32 %v1537_v50, %v1533_v49 }
0x1b1e   :  { %1541 = vrot.lane.b32.xlu1 %v1539_v51, %s3126_s12 }
0x1b90   :  { %v1542_v52 = vpop.permute.xlu1 %1541 }
0x1b91   :  { %v1544_v53 = vadd.f32 %v1542_v52, %v1534_v39 }
0x1b93   :  { %2980 = vtanh.f32 %v1544_v53 }
0x1b9d   :  { %v2981_v54 = vpop.eup %2980 }
0x1b9e   :  { %1547 = vrot.lane.b32.xlu0 %v2981_v54, %s3125_s1 }
0x1c10   :  { %v1548_v55 = vpop.permute.xlu0 %1547 }
0x1c11   :  { %v1550_v56 = vmul.f32 %v1548_v55, %v1533_v49 }
0x1c13   :  { %1553 = vrot.lane.b32.xlu1 %v1550_v56, %s3126_s12 }
0x1c85   :  { %v1554_v57 = vpop.permute.xlu1 %1553 }
0x1c86   :  { %2625 = vmatmul.mubr.msk.f32.vlgmr.msra.gmra.mrb[12].mxu0 %vm241_vm4, %v1554_v57  ;;  %v1229_v57 = vadd.f32 %v3488_v32, %v3530_v26 }
0x1c87   :  { %2837 = vmatpush3.bf16.msra.mxu0 %v3452_v4  ;;  %2646 = vmatprep.mubr.msk.f32.mxu0 %vm3123_vm0, %v3124_v1 }
0x1c88   :  { %2838 = vmatprep.subr.bf16.mxu0 %v3122_v0 }
0x1c8b   :  { %2840 = vmatpush3.bf16.msra.mxu0 %v3457_v10 }
0x1c8c   :  { %2847 = vmatprep.subr.bf16.mxu0 %v3122_v0 }
0x1d59   :  { %v1623_v58 = vpop.f32.mrb[12].mxu0 }
0x1d5a   :  { %v1627_v59 = vadd.f32 %v1623_v58, %v1214_v15  ;;  %v2626_v19 = vpop.f32.mrb[13].mxu0 }
0x1d5c   :  { %v2281_v60 = vmul.f32 -1.442695, %v1627_v59 }
0x1d5e   :  { %2982 = vpow2.f32 %v2281_v60 }
0x1d5f   :  { %2984 = vtanh.f32 %v1627_v59 }
0x1d68   :  { %v2983_v61 = vpop.eup %2982 }
0x1d69   :  { %v1631_v63 = vadd.f32 1.0, %v2983_v61  ;;  %v2985_v2 = vpop.eup %2984 }
0x1d6b   :  { %2986 = vrcp.f32 %v1631_v63 }
0x1d75   :  { %v2987_v3 = vpop.eup %2986 }
0x1d76   :  { %v1635_v5 = vsel %vm3330_vm3, %v2985_v2, %v2987_v3 }
0x1d77   :  { %1638 = vrot.lane.b32.xlu0 %v1635_v5, %s3125_s1  ;;  %v1636_v38 = vmul.f32 %v1635_v5, %v1544_v53 }
0x1de9   :  { %v1639_v6 = vpop.permute.xlu0 %1638 }
0x1dea   :  { %v1641_v7 = vmul.f32 %v1639_v6, %v1635_v5 }
0x1dec   :  { %1643 = vrot.lane.b32.xlu1 %v1641_v7, %s3126_s12 }
0x1e5e   :  { %v1644_v8 = vpop.permute.xlu1 %1643 }
0x1e5f   :  { %v1646_v9 = vadd.f32 %v1644_v8, %v1636_v38 }
0x1e61   :  { %2988 = vtanh.f32 %v1646_v9 }
0x1e6b   :  { %v2989_v11 = vpop.eup %2988 }
0x1e6c   :  { %1649 = vrot.lane.b32.xlu0 %v2989_v11, %s3125_s1 }
0x1ede   :  { %v1650_v62 = vpop.permute.xlu0 %1649 }
0x1edf   :  { %v1652_v12 = vmul.f32 %v1650_v62, %v1635_v5 }
0x1ee1   :  { %1655 = vrot.lane.b32.xlu1 %v1652_v12, %s3126_s12  ;;  %v1234_v12 = vadd.f32 %v3528_v25, %v3488_v32 }
0x1f53   :  { %v1656_v13 = vpop.permute.xlu1 %1655 }
0x1f54   :  { %2636 = vmatmul.mubr.msk.f32.vlgmr.msra.gmra.mrb[26].mxu1 %vm241_vm4, %v1656_v13 }
0x1f55   :  { %2843 = vmatpush3.bf16.msra.mxu1 %v3452_v4  ;;  %2657 = vmatprep.mubr.msk.f32.mxu1 %vm3123_vm0, %v3124_v1 }
0x1f56   :  { %2844 = vmatprep.subr.bf16.mxu1 %v3122_v0 }
0x1f59   :  { %2846 = vmatpush3.bf16.msra.mxu1 %v3457_v10 }
0x1f5a   :  { %2853 = vmatprep.subr.bf16.mxu1 %v3122_v0 }
0x2027   :  { %v1725_v16 = vpop.f32.mrb[26].mxu1 }
0x2028   :  { %v1729_v17 = vadd.f32 %v1725_v16, %v1219_v14  ;;  %v2637_v18 = vpop.f32.mrb[27].mxu1 }
0x202a   :  { %v2283_v20 = vmul.f32 -1.442695, %v1729_v17 }
0x202c   :  { %2990 = vpow2.f32 %v2283_v20 }
0x202d   :  { %2992 = vtanh.f32 %v1729_v17 }
0x2036   :  { %v2991_v21 = vpop.eup %2990 }
0x2037   :  { %v1733_v22 = vadd.f32 1.0, %v2991_v21  ;;  %v2993_v23 = vpop.eup %2992 }
0x2039   :  { %2994 = vrcp.f32 %v1733_v22 }
0x2043   :  { %v2995_v24 = vpop.eup %2994 }
0x2044   :  { %v1737_v27 = vsel %vm3330_vm3, %v2993_v23, %v2995_v24 }
0x2045   :  { %1740 = vrot.lane.b32.xlu0 %v1737_v27, %s3125_s1  ;;  %v1738_v41 = vmul.f32 %v1737_v27, %v1646_v9 }
0x20b7   :  { %v1741_v28 = vpop.permute.xlu0 %1740 }
0x20b8   :  { %v1743_v29 = vmul.f32 %v1741_v28, %v1737_v27  ;;  %v2061_v28 = vld [vmem:[#allocation8] sm:$0xff] }
0x20ba   :  { %1745 = vrot.lane.b32.xlu1 %v1743_v29, %s3126_s12  ;;  %v2062_v29 = vld [vmem:[#allocation8 + $0x8] sm:$0xff] }
0x212c   :  { %v1746_v30 = vpop.permute.xlu1 %1745 }
0x212d   :  { %v1748_v31 = vadd.f32 %v1746_v30, %v1738_v41  ;;  %v2063_v41 = vld [vmem:[#allocation8 + $0x10] sm:$0xff]  ;;  %v2854_v30 = vpack.c.bf16 %v2062_v29, %v2061_v28 }
0x212f   :  { %2996 = vtanh.f32 %v1748_v31 }
0x2139   :  { %v2997_v33 = vpop.eup %2996 }
0x213a   :  { %1751 = vrot.lane.b32.xlu0 %v2997_v33, %s3125_s1 }
0x21ac   :  { %v1752_v34 = vpop.permute.xlu0 %1751 }
0x21ad   :  { %v1754_v35 = vmul.f32 %v1752_v34, %v1737_v27  ;;  %v2148_v34 = vld [vmem:[#allocation9] sm:$0xff] }
0x21af   :  { %1757 = vrot.lane.b32.xlu1 %v1754_v35, %s3126_s12  ;;  %v2149_v35 = vld [vmem:[#allocation9 + $0x8] sm:$0xff] }
0x2221   :  { %v1758_v37 = vpop.permute.xlu1 %1757 }
0x2222   :  { %2647 = vmatmul.mubr.msk.f32.vlgmr.msra.gmra.mrb[14].mxu0 %vm241_vm4, %v1758_v37  ;;  %v2150_v37 = vld [vmem:[#allocation9 + $0x10] sm:$0xff] }
0x2223   :  { %2849 = vmatpush3.bf16.msra.mxu0 %v3452_v4  ;;  %2668 = vmatprep.mubr.msk.f32.mxu0 %vm3123_vm0, %v3124_v1 }
0x2224   :  { %2850 = vmatprep.subr.bf16.mxu0 %v3122_v0 }
0x2227   :  { %2852 = vmatpush3.bf16.msra.mxu0 %v3457_v10 }
0x2228   :  { %2859 = vmatprep.subr.bf16.mxu0 %v3122_v0 }
0x22f5   :  { %v1827_v42 = vpop.f32.mrb[14].mxu0 }
0x22f6   :  { %v1831_v43 = vadd.f32 %v1827_v42, %v1224_v40  ;;  %v2648_v44 = vpop.f32.mrb[15].mxu0  ;;  %v2860_v40 = vpack.c.bf16 %v2149_v35, %v2148_v34  ;;  %v2151_v42 = vld [vmem:[#allocation9 + $0x18] sm:$0xff] }
0x22f7   :  { %v2152_v44 = vld [vmem:[#allocation9 + $0x20] sm:$0xff] }
0x22f8   :  { %v2285_v45 = vmul.f32 -1.442695, %v1831_v43 }
0x22fa   :  { %2998 = vpow2.f32 %v2285_v45  ;;  %v2153_v45 = vld [vmem:[#allocation9 + $0x28] sm:$0xff] }
0x22fb   :  { %3000 = vtanh.f32 %v1831_v43  ;;  %v2863_v43 = vpack.c.bf16 %v2151_v42, %v2150_v37 }
0x2304   :  { %v2999_v47 = vpop.eup %2998 }
0x2305   :  { %v1835_v48 = vadd.f32 1.0, %v2999_v47  ;;  %v3001_v4 = vpop.eup %3000  ;;  %v2866_v47 = vpack.c.bf16 %v2153_v45, %v2152_v44 }
0x2307   :  { %3002 = vrcp.f32 %v1835_v48  ;;  %v2154_v48 = vld [vmem:[#allocation9 + $0x30] sm:$0xff] }
0x2311   :  { %v3003_v49 = vpop.eup %3002 }
0x2312   :  { %v1839_v50 = vsel %vm3330_vm3, %v3001_v4, %v3003_v49  ;;  %v2155_v4 = vld [vmem:[#allocation9 + $0x38] sm:$0xff] }
0x2313   :  { %1842 = vrot.lane.b32.xlu0 %v1839_v50, %s3125_s1  ;;  %v1840_v36 = vmul.f32 %v1839_v50, %v1748_v31  ;;  %v2064_v31 = vld [vmem:[#allocation8 + $0x18] sm:$0xff] }
0x2314   :  { %v2857_v33 = vpack.c.bf16 %v2064_v31, %v2063_v41 }
0x2385   :  { %v1843_v10 = vpop.permute.xlu0 %1842 }
0x2386   :  { %v1845_v51 = vmul.f32 %v1843_v10, %v1839_v50  ;;  %v2869_v10 = vpack.c.bf16 %v2155_v4, %v2154_v48 }
0x2388   :  { %1847 = vrot.lane.b32.xlu1 %v1845_v51, %s3126_s12  ;;  %v2156_v51 = vld [vmem:[#allocation9 + $0x40] sm:$0xff] }
0x23fa   :  { %v1848_v39 = vpop.permute.xlu1 %1847 }
0x23fb   :  { %v1850_v52 = vadd.f32 %v1848_v39, %v1840_v36  ;;  %v2157_v36 = vld [vmem:[#allocation9 + $0x48] sm:$0xff] }
0x23fc   :  { %v2872_v39 = vpack.c.bf16 %v2157_v36, %v2156_v51 }
0x23fd   :  { %3004 = vtanh.f32 %v1850_v52 }
0x2407   :  { %v3005_v53 = vpop.eup %3004 }
0x2408   :  { %1853 = vrot.lane.b32.xlu0 %v3005_v53, %s3125_s1  ;;  %v2159_v53 = vld [vmem:[#allocation9 + $0x58] sm:$0xff] }
0x247a   :  { %v1854_v54 = vpop.permute.xlu0 %1853 }
0x247b   :  { %v1856_v55 = vmul.f32 %v1854_v54, %v1839_v50 }
0x247d   :  { %1859 = vrot.lane.b32.xlu1 %v1856_v55, %s3126_s12  ;;  %v2160_v55 = vld [vmem:[#allocation9 + $0x60] sm:$0xff] }
0x24ef   :  { %v1860_v56 = vpop.permute.xlu1 %1859 }
0x24f0   :  { %2658 = vmatmul.mubr.msk.f32.vlgmr.msra.gmra.mrb[28].mxu1 %vm241_vm4, %v1860_v56  ;;  %v2161_v56 = vld [vmem:[#allocation9 + $0x68] sm:$0xff] }
0x24f1   :  { %2679 = vmatprep.mubr.msk.f32.mxu1 %vm3123_vm0, %v3124_v1  ;;  %2855 = vmatpush3.bf16.msra.mxu1 %v2854_v30 }
0x24f2   :  { %2856 = vmatprep.subr.bf16.mxu1 %v3122_v0 }
0x24f5   :  { %2858 = vmatpush3.bf16.msra.mxu1 %v2857_v33 }
0x25c3   :  { %v1929_v15 = vpop.f32.mrb[28].mxu1 }
0x25c4   :  { %v1933_v58 = vadd.f32 %v1929_v15, %v1229_v57  ;;  %v2659_v59 = vpop.f32.mrb[29].mxu1  ;;  %v2878_v57 = vpack.c.bf16 %v2161_v56, %v2160_v55 }
0x25c5   :  { %v2163_v59 = vld [vmem:[#allocation9 + $0x78] sm:$0xff] }
0x25c6   :  { %v2287_v19 = vmul.f32 -1.442695, %v1933_v58 }
0x25c8   :  { %3006 = vpow2.f32 %v2287_v19 }
0x25c9   :  { %3008 = vtanh.f32 %v1933_v58  ;;  %v2162_v58 = vld [vmem:[#allocation9 + $0x70] sm:$0xff] }
0x25ca   :  { %v2881_v19 = vpack.c.bf16 %v2163_v59, %v2162_v58 }
0x25d2   :  { %v3007_v60 = vpop.eup %3006 }
0x25d3   :  { %v1937_v61 = vadd.f32 1.0, %v3007_v60  ;;  %v3009_v63 = vpop.eup %3008  ;;  %v2290_v60 = vld [vmem:[%s3640_s6] ss:$0 sm:$0xff] }
0x25d5   :  { %3010 = vrcp.f32 %v1937_v61 }
0x25df   :  { %v3011_v2 = vpop.eup %3010 }
0x25e0   :  { %v1941_v3 = vsel %vm3330_vm3, %v3009_v63, %v3011_v2 }
0x25e1   :  { %1944 = vrot.lane.b32.xlu0 %v1941_v3, %s3125_s1  ;;  %v1942_v26 = vmul.f32 %v1941_v3, %v1850_v52  ;;  %v2158_v52 = vld [vmem:[#allocation9 + $0x50] sm:$0xff] }
0x25e2   :  { %v2875_v54 = vpack.c.bf16 %v2159_v53, %v2158_v52 }
0x2653   :  { %v1945_v5 = vpop.permute.xlu0 %1944 }
0x2654   :  { %v1947_v6 = vmul.f32 %v1945_v5, %v1941_v3 }
0x2656   :  { %1949 = vrot.lane.b32.xlu1 %v1947_v6, %s3126_s12 }
0x26c8   :  { %v1950_v7 = vpop.permute.xlu1 %1949 }
0x26c9   :  { %v1952_v38 = vadd.f32 %v1950_v7, %v1942_v26 }
0x26cb   :  { %3012 = vtanh.f32 %v1952_v38 }
0x26d5   :  { %v3013_v8 = vpop.eup %3012 }
0x26d6   :  { %1955 = vrot.lane.b32.xlu0 %v3013_v8, %s3125_s1 }
0x2748   :  { %v1956_v9 = vpop.permute.xlu0 %1955 }
0x2749   :  { %v1958_v11 = vmul.f32 %v1956_v9, %v1941_v3 }
0x274b   :  { %1961 = vrot.lane.b32.xlu1 %v1958_v11, %s3126_s12 }
0x27bd   :  { %v1962_v62 = vpop.permute.xlu1 %1961 }
0x27be   :  { %2669 = vmatmul.mubr.msk.f32.vlgmr.msra.gmra.mrb[16].mxu0 %vm241_vm4, %v1962_v62 }
0x27bf   :  { %2714 = vmatprep.mubr.msk.f32.mxu0 %vm3123_vm0, %v3124_v1  ;;  %2861 = vmatpush3.bf16.msra.mxu0 %v2860_v40 }
0x27c0   :  { %2862 = vmatprep.subr.bf16.mxu0 %v3122_v0 }
0x27c3   :  { %2864 = vmatpush3.bf16.msra.mxu0 %v2863_v43 }
0x27c4   :  { %2865 = vmatprep.subr.bf16.mxu0 %v3122_v0 }
0x27c7   :  { %2867 = vmatpush3.bf16.msra.mxu0 %v2866_v47 }
0x27c8   :  { %2868 = vmatprep.subr.bf16.mxu0 %v3122_v0 }
0x27cb   :  { %2870 = vmatpush3.bf16.msra.mxu0 %v2869_v10 }
0x27cc   :  { %2871 = vmatprep.subr.bf16.mxu0 %v3122_v0 }
0x27cf   :  { %2873 = vmatpush3.bf16.msra.mxu0 %v2872_v39 }
0x27d0   :  { %2874 = vmatprep.subr.bf16.mxu0 %v3122_v0 }
0x27d3   :  { %2876 = vmatpush3.bf16.msra.mxu0 %v2875_v54 }
0x27d4   :  { %2877 = vmatprep.subr.bf16.mxu0 %v3122_v0 }
0x27d7   :  { %2879 = vmatpush3.bf16.msra.mxu0 %v2878_v57 }
0x27d8   :  { %2880 = vmatprep.subr.bf16.mxu0 %v3122_v0  ;;  %v2292_v0 = vld [vmem:[%s3642_s8] ss:$0 sm:$0xff] }
0x27db   :  { %2882 = vmatpush3.bf16.msra.mxu0 %v2881_v19 }
0x2891   :  { %v2031_v13 = vpop.f32.mrb[16].mxu0 }
0x2892   :  { %v2035_v14 = vadd.f32 %v2031_v13, %v1234_v12  ;;  %v2670_v16 = vpop.f32.mrb[17].mxu0 }
0x2894   :  { %v2289_v17 = vmul.f32 -1.442695, %v2035_v14 }
0x2896   :  { %3014 = vpow2.f32 %v2289_v17 }
0x2897   :  { %3016 = vtanh.f32 %v2035_v14 }
0x28a0   :  { %v3015_v18 = vpop.eup %3014 }
0x28a1   :  { %v2039_v20 = vadd.f32 1.0, %v3015_v18  ;;  %v3017_v21 = vpop.eup %3016 }
0x28a3   :  { %3018 = vrcp.f32 %v2039_v20 }
0x28ad   :  { %v3019_v22 = vpop.eup %3018 }
0x28ae   :  { %v2043_v23 = vsel %vm3330_vm3, %v3017_v21, %v3019_v22 }
0x28af   :  { %2046 = vrot.lane.b32.xlu0 %v2043_v23, %s3125_s1  ;;  %v2044_v32 = vmul.f32 %v2043_v23, %v1952_v38 }
0x2921   :  { %v2047_v1 = vpop.permute.xlu0 %2046 }
0x2922   :  { %v2049_v24 = vmul.f32 %v2047_v1, %v2043_v23 }
0x2924   :  { %2051 = vrot.lane.b32.xlu1 %v2049_v24, %s3126_s12 }
0x2996   :  { %v2052_v25 = vpop.permute.xlu1 %2051 }
0x2997   :  { %v2054_v27 = vadd.f32 %v2052_v25, %v2044_v32 }
0x2999   :  { %3020 = vtanh.f32 %v2054_v27 }
0x29a3   :  { %v3021_v46 = vpop.eup %3020 }
0x29a4   :  { %2057 = vrot.lane.b32.xlu0 %v3021_v46, %s3125_s1 }
0x2a16   :  { %v2058_v49 = vpop.permute.xlu0 %2057 }
0x2a17   :  { %v2060_v50 = vmul.f32 %v2058_v49, %v2043_v23 }
0x2a19   :  { %2073 = vrot.lane.b32.xlu1 %v2060_v50, %s3126_s12 }
0x2a8b   :  { %v2074_v15 = vpop.permute.xlu1 %2073 }
0x2a8c   :  { %2680 = vmatmul.mubr.msk.f32.vlgmr.msra.gmra.mrb[30].mxu1 %vm241_vm4, %v2074_v15 }
0x2b5f   :  { %v2143_v61 = vpop.f32.mrb[30].mxu1 }
0x2b60   :  { %v2144_v63 = vadd.f32 %v2290_v60, %v2143_v61  ;;  %v2681_v2 = vpop.f32.mrb[31].mxu1 }
0x2b62   :  { %v2147_v3 = vmax.f32 %v2144_v63, 0.0 }
0x2b64   :  { %2715 = vmatmul.mubr.f32.vlgmr.msra.gmra.mrb[18].mxu0 %v2147_v3 }
0x2c37   :  { %v2237_v5 = vpop.f32.mrb[18].mxu0 }
0x2c38   :  { %v2238_v6 = vadd.f32 %v2292_v0, %v2237_v5  ;;  %v2716_v26 = vpop.f32.mrb[19].mxu0 }
0x2c3a   :  { %2241 = vst [vmem:[%s3643_s9] sm:$0xff] %v2238_v6 }
0x2c3b   :  { %2246 = vsyncpa [#allocation5], 1 }
0x2c3c   :  { %2247 = vsyncpa [#allocation7], 1 }
0x2c3d   :  { %2248 = vsyncpa [#allocation10], 1 }

</bundles_post_ra>
